<compile_context>
chip_gen: v7x
topology: tpu7x:2x2x1
jax: 0.10.0
libtpu: 0.0.40
codegen_flags: <defaults>
</compile_context>

<pallas_src>
import functools

import jax
import jax.numpy as jnp
from jax import lax
from jax.experimental import pallas as pl
from jax.experimental.pallas import tpu as pltpu

VMEM_SPEC = pl.BlockSpec(memory_space=pltpu.MemorySpace.VMEM)
_BN_EPS = 1e-5


# --------------------------------------------------------------------------
# In-kernel helpers
# --------------------------------------------------------------------------
def _mm(a, w_bf16):
    """MXU matmul: bf16 operands (weights pre-cast once), f32 accumulation."""
    return jnp.dot(a.astype(jnp.bfloat16), w_bf16,
                   preferred_element_type=jnp.float32)


def _batchnorm(y, gamma, beta):
    """Training-mode BatchNorm1d, single pass (var = E[x^2]-E[x]^2) over rows."""
    m = jnp.mean(y, axis=0, keepdims=True)
    var = jnp.mean(y * y, axis=0, keepdims=True) - m * m
    return (y - m) * lax.rsqrt(var + _BN_EPS) * gamma + beta


# --------------------------------------------------------------------------
# The single fused CBHG kernel
# --------------------------------------------------------------------------
def _cbhg_kernel(x_ref, wbank_ref, gbank_ref, bbank_ref,
                 wp1_ref, g1_ref, b1_ref,
                 wp2_ref, g2_ref, b2_ref,
                 wpre_ref, wht_ref, bht_ref,
                 wih_ref, bih_ref, whhf_ref, whhb_ref, bhhf_ref, bhhb_ref,
                 o_ref,
                 xpad_sc, ypad_sc, p1pad_sc, gxf_sc, gxb_sc, out_sc,
                 *, K, n_highway):
    B, T, C = x_ref.shape
    BT = B * T
    H = C
    KC = K * C
    PL = K // 2
    P1 = g1_ref.shape[-1]

    x = x_ref[...].astype(jnp.float32)                    # (B, T, C)
    x_flat = x.reshape(BT, C)

    # ---- Conv1d bank: sum of K shifted (BT,C)x(C,K*C) matmuls (no im2col slab)
    if PL:
        zpad = jnp.zeros((B, PL, C), jnp.float32)
        xpad_sc[:, 0:PL, :] = zpad
        xpad_sc[:, PL + T:PL + T + PL, :] = zpad
    xpad_sc[:, PL:PL + T, :] = x
    bank = None
    for j in range(K):                                    # static, K small
        xs = xpad_sc[:, j:j + T, :].reshape(BT, C)        # x[:, t + j - PL]
        contrib = _mm(xs, wbank_ref[j * C:(j + 1) * C, :])
        bank = contrib if bank is None else bank + contrib
    bank = _batchnorm(jnp.maximum(bank, 0.0), gbank_ref[...], bbank_ref[...])

    # ---- MaxPool1d(kernel=2, stride=1, pad=1)[:, :T]: out[t]=max(y[t-1],y[t])
    y3 = bank.reshape(B, T, KC)
    prev = jnp.concatenate([y3[:, :1, :], y3[:, :-1, :]], axis=1)
    y3 = jnp.maximum(y3, prev)

    # ---- Conv projection 1 (k=3) + ReLU + BN: 3 shifted matmuls ----
    zp1 = jnp.zeros((B, 1, KC), jnp.float32)
    ypad_sc[:, 0:1, :] = zp1
    ypad_sc[:, T + 1:T + 2, :] = zp1
    ypad_sc[:, 1:T + 1, :] = y3
    p1 = None
    for j in range(3):
        ys = ypad_sc[:, j:j + T, :].reshape(BT, KC)
        c = _mm(ys, wp1_ref[j * KC:(j + 1) * KC, :])
        p1 = c if p1 is None else p1 + c
    p1 = _batchnorm(jnp.maximum(p1, 0.0), g1_ref[...], b1_ref[...])

    # ---- Conv projection 2 (k=3, no activation) + BN ----
    zp2 = jnp.zeros((B, 1, P1), jnp.float32)
    p1pad_sc[:, 0:1, :] = zp2
    p1pad_sc[:, T + 1:T + 2, :] = zp2
    p1pad_sc[:, 1:T + 1, :] = p1.reshape(B, T, P1)
    p2 = None
    for j in range(3):
        ps = p1pad_sc[:, j:j + T, :].reshape(BT, P1)
        c = _mm(ps, wp2_ref[j * P1:(j + 1) * P1, :])
        p2 = c if p2 is None else p2 + c
    p2 = _batchnorm(p2, g2_ref[...], b2_ref[...])

    # ---- pre_highway Linear (no bias) + residual add of the original inputs --
    xh = _mm(p2, wpre_ref[...]) + x_flat                  # (BT, C)

    # ---- Highway (shared H/T layers fused into one (C,2C) matmul per iter) ---
    wht = wht_ref[...]
    bht = jnp.broadcast_to(bht_ref[...], (BT, 2 * C))     # hoisted broadcast
    for _ in range(n_highway):
        g = _mm(xh, wht) + bht
        hgate = jnp.maximum(g[:, :C], 0.0)
        tgate = jax.nn.sigmoid(g[:, C:])
        xh = xh + tgate * (hgate - xh)                    # == h*t + x*(1-t)

    # ---- Bi-GRU -------------------------------------------------------------
    # Input projections for both directions in one matmul; stage them
    # time-major in VMEM so the serial loop only does leading-axis dynamic
    # loads (one contiguous (B,3H) slice per direction per step).
    gx = _mm(xh, wih_ref[...]) + bih_ref[...]             # (BT, 6H)
    for b in range(B):                                    # static layout shuffle
        gxf_sc[:, b, :] = gx[b * T:(b + 1) * T, 0:3 * H]
        gxb_sc[:, b, :] = gx[b * T:(b + 1) * T, 3 * H:6 * H]

    whh_f = whhf_ref[...]                                 # f32 (H, 3H)
    whh_b = whhb_ref[...]
    bhh_f = jnp.broadcast_to(bhhf_ref[...], (B, 3 * H))   # hoisted broadcasts
    bhh_b = jnp.broadcast_to(bhhb_ref[...], (B, 3 * H))

    def _gru_cell(g_in, g_h, h_prev):
        r = jax.nn.sigmoid(g_in[:, 0:H] + g_h[:, 0:H])
        z = jax.nn.sigmoid(g_in[:, H:2 * H] + g_h[:, H:2 * H])
        n = jnp.tanh(g_in[:, 2 * H:] + r * g_h[:, 2 * H:])
        return n + z * (h_prev - n)                       # (1-z)*n + z*h

    def _step(s, carry):
        h_f, h_b = carry
        g_f = gxf_sc[s]                                   # (B, 3H)
        g_b = gxb_sc[T - 1 - s]                           # (B, 3H)
        # Recurrent matmuls kept in f32: tiny, avoids bf16 drift over T steps.
        gh_f = jnp.dot(h_f, whh_f, preferred_element_type=jnp.float32) + bhh_f
        gh_b = jnp.dot(h_b, whh_b, preferred_element_type=jnp.float32) + bhh_b
        h_f = _gru_cell(g_f, gh_f, h_f)
        h_b = _gru_cell(g_b, gh_b, h_b)
        out_sc[pl.ds(s, 1), :, 0:H] = h_f[None]
        out_sc[pl.ds(T - 1 - s, 1), :, H:2 * H] = h_b[None]
        return h_f, h_b

    h0 = jnp.zeros((B, H), jnp.float32)
    lax.fori_loop(0, T, _step, (h0, h0))

    # ---- time-major scratch -> (B, T, 2H) output, B contiguous stores --------
    for b in range(B):
        o_ref[b, :, :] = out_sc[:, b, :]


# --------------------------------------------------------------------------
# Wrapper: exactly one pallas_call
# --------------------------------------------------------------------------
def _vmem_limit_bytes():
    """Raise the scoped-VMEM limit per generation, leaving headroom."""
    try:
        cap = int(pltpu.get_tpu_info().vmem_capacity_bytes)
        if cap > 0:
            return (cap * 7) // 8          # ~112 MiB on v5e/v6e, ~56 MiB on v7x
    except Exception:
        pass
    return 56 * 1024 * 1024                # safe on every generation


def cbhg_forward(inputs, fp, *, K, n_highway=4):
    """inputs: (B, T, C); fp: fused params (see fuse_params). Returns (B, T, 2C)."""
    B, T, C = inputs.shape
    P1 = fp['wp1'].shape[1]
    PL = K // 2
    kernel = functools.partial(_cbhg_kernel, K=K, n_highway=n_highway)
    return pl.pallas_call(
        kernel,
        out_shape=jax.ShapeDtypeStruct((B, T, 2 * C), jnp.float32),
        in_specs=[VMEM_SPEC] * 19,
        out_specs=VMEM_SPEC,
        scratch_shapes=[
            pltpu.VMEM((B, T + 2 * PL, C), jnp.float32),   # zero-padded x
            pltpu.VMEM((B, T + 2, K * C), jnp.float32),    # zero-padded pooled bank
            pltpu.VMEM((B, T + 2, P1), jnp.float32),       # zero-padded proj1
            pltpu.VMEM((T, B, 3 * C), jnp.float32),        # fwd GRU input gates
            pltpu.VMEM((T, B, 3 * C), jnp.float32),        # bwd GRU input gates
            pltpu.VMEM((T, B, 2 * C), jnp.float32),        # time-major GRU outputs
        ],
        compiler_params=pltpu.CompilerParams(
            vmem_limit_bytes=_vmem_limit_bytes()),
    )(inputs, fp['wbank'], fp['gbank'], fp['bbank'],
      fp['wp1'], fp['g1'], fp['b1'],
      fp['wp2'], fp['g2'], fp['b2'],
      fp['wpre'], fp['wht'], fp['bht'],
      fp['wih'], fp['bih'], fp['whh_f'], fp['whh_b'], fp['bhh_f'], fp['bhh_b'])


# --------------------------------------------------------------------------
# Parameter construction + one-time weight fusion (plain JAX, outside kernel)
# --------------------------------------------------------------------------
def init_params(key, C, K, P1, P2):
    keys = iter(jax.random.split(key, 64))

    def rnd(shape, scale=0.2):
        return scale * jax.random.normal(next(keys), shape, jnp.float32)

    params = {'bank': []}
    for k in range(1, K + 1):
        params['bank'].append(dict(
            w=rnd((k, C, C)),                    # conv weight (tap, Cin, Cout)
            gamma=1.0 + rnd((1, C), 0.1),
            beta=rnd((1, C), 0.1)))
    params['proj1'] = dict(w=rnd((3, K * C, P1)),
                           gamma=1.0 + rnd((1, P1), 0.1), beta=rnd((1, P1), 0.1))
    params['proj2'] = dict(w=rnd((3, P1, P2)),
                           gamma=1.0 + rnd((1, P2), 0.1), beta=rnd((1, P2), 0.1))
    params['pre_w'] = rnd((P2, C))               # Linear(P2->C, bias=False), transposed
    params['wh'] = rnd((C, C))
    params['bh'] = jnp.zeros((1, C), jnp.float32)        # Highway H bias = 0
    params['wt'] = rnd((C, C))
    params['bt'] = -1.0 * jnp.ones((1, C), jnp.float32)  # Highway T bias = -1
    params['gru'] = dict(                        # PyTorch gate order r|z|n, transposed
        wih_f=rnd((C, 3 * C)), whh_f=rnd((C, 3 * C)),
        bih_f=rnd((1, 3 * C), 0.1), bhh_f=rnd((1, 3 * C), 0.1),
        wih_b=rnd((C, 3 * C)), whh_b=rnd((C, 3 * C)),
        bih_b=rnd((1, 3 * C), 0.1), bhh_b=rnd((1, 3 * C), 0.1))
    return params


def fuse_params(params, K, C):
    """One-time prep: pack weights into the shapes the fused kernel consumes.

    Large matmul weights are pre-cast to bf16 (halves VMEM/DMA); BN params and
    the recurrent GRU weights stay f32.
    """
    PL = K // 2
    bf16 = jnp.bfloat16
    # Combined bank weight: rows = shifted-window blocks, cols = bank branches.
    wbank = jnp.zeros((K * C, K * C), jnp.float32)
    for k in range(1, K + 1):
        w = params['bank'][k - 1]['w']           # (k, C, C)
        pk = k // 2
        for j in range(k):
            wbank = lax.dynamic_update_slice(
                wbank, w[j], ((j - pk + PL) * C, (k - 1) * C))
    g = params['gru']
    w1, w2 = params['proj1']['w'], params['proj2']['w']
    return dict(
        wbank=wbank.astype(bf16),
        gbank=jnp.concatenate([p['gamma'] for p in params['bank']], axis=-1),
        bbank=jnp.concatenate([p['beta'] for p in params['bank']], axis=-1),
        wp1=w1.reshape(-1, w1.shape[2]).astype(bf16),
        g1=params['proj1']['gamma'], b1=params['proj1']['beta'],
        wp2=w2.reshape(-1, w2.shape[2]).astype(bf16),
        g2=params['proj2']['gamma'], b2=params['proj2']['beta'],
        wpre=params['pre_w'].astype(bf16),
        wht=jnp.concatenate([params['wh'], params['wt']], axis=1).astype(bf16),
        bht=jnp.concatenate([params['bh'], params['bt']], axis=-1),
        wih=jnp.concatenate([g['wih_f'], g['wih_b']], axis=1).astype(bf16),
        bih=jnp.concatenate([g['bih_f'], g['bih_b']], axis=-1),
        whh_f=g['whh_f'], whh_b=g['whh_b'],      # f32: serial recurrence stays f32
        bhh_f=g['bhh_f'], bhh_b=g['bhh_b'])


if __name__ == "__main__":
    B, T, C = 2, 8, 16          # batch, time, input_size
    K = 4                       # conv bank size
    P1 = P2 = 32                # projection sizes

    key = jax.random.PRNGKey(0)
    k_in, k_par = jax.random.split(key)
    inputs = jax.random.normal(k_in, (B, T, C), jnp.float32)
    params = init_params(k_par, C, K, P1, P2)
    fused = fuse_params(params, K, C)            # one-time weight packing

    fwd = jax.jit(functools.partial(cbhg_forward, K=K))
    out = jax.block_until_ready(fwd(inputs, fused))
    assert out.shape == (B, T, 2 * C), out.shape
    assert bool(jnp.all(jnp.isfinite(out)))
    print("KERNEL_OK")
</pallas_src>

<mosaic_0001>
module attributes {stable_mosaic.version = 11 : i64} {
  func.func @_cbhg_kernel(%arg0: memref<2x8x16xf32, #tpu.memory_space<vmem>>, %arg1: memref<64x64xbf16, #tpu.memory_space<vmem>>, %arg2: memref<1x64xf32, #tpu.memory_space<vmem>>, %arg3: memref<1x64xf32, #tpu.memory_space<vmem>>, %arg4: memref<192x32xbf16, #tpu.memory_space<vmem>>, %arg5: memref<1x32xf32, #tpu.memory_space<vmem>>, %arg6: memref<1x32xf32, #tpu.memory_space<vmem>>, %arg7: memref<96x32xbf16, #tpu.memory_space<vmem>>, %arg8: memref<1x32xf32, #tpu.memory_space<vmem>>, %arg9: memref<1x32xf32, #tpu.memory_space<vmem>>, %arg10: memref<32x16xbf16, #tpu.memory_space<vmem>>, %arg11: memref<16x32xbf16, #tpu.memory_space<vmem>>, %arg12: memref<1x32xf32, #tpu.memory_space<vmem>>, %arg13: memref<16x96xbf16, #tpu.memory_space<vmem>>, %arg14: memref<1x96xf32, #tpu.memory_space<vmem>>, %arg15: memref<16x48xf32, #tpu.memory_space<vmem>>, %arg16: memref<16x48xf32, #tpu.memory_space<vmem>>, %arg17: memref<1x48xf32, #tpu.memory_space<vmem>>, %arg18: memref<1x48xf32, #tpu.memory_space<vmem>>, %arg19: memref<2x8x32xf32, #tpu.memory_space<vmem>>, %arg20: memref<2x12x16xf32, #tpu.memory_space<vmem>>, %arg21: memref<2x10x64xf32, #tpu.memory_space<vmem>>, %arg22: memref<2x10x32xf32, #tpu.memory_space<vmem>>, %arg23: memref<8x2x48xf32, #tpu.memory_space<vmem>>, %arg24: memref<8x2x48xf32, #tpu.memory_space<vmem>>, %arg25: memref<8x2x32xf32, #tpu.memory_space<vmem>>) attributes {dimension_semantics = [], scalar_prefetch = 0 : i64, scratch_operands = 6 : i64, tpu.core_type = #tpu.core_type<tc>} {
    %c0 = arith.constant 0 : index
    %c0_0 = arith.constant 0 : index
    %c0_1 = arith.constant 0 : index
    %0 = vector.load %arg0[%c0, %c0_0, %c0_1] : memref<2x8x16xf32, #tpu.memory_space<vmem>>, vector<2x8x16xf32>
    %1 = vector.shape_cast %0 : vector<2x8x16xf32> to vector<16x16xf32>
    %cst = arith.constant 0.000000e+00 : f32
    %2 = vector.broadcast %cst : f32 to vector<2x2x16xf32>
    %c0_2 = arith.constant 0 : index
    %c0_3 = arith.constant 0 : index
    %c0_4 = arith.constant 0 : index
    %3 = vector.load %arg20[%c0_2, %c0_3, %c0_4] : memref<2x12x16xf32, #tpu.memory_space<vmem>>, vector<2x2x16xf32>
    tpu.vector_store %arg20[%c0_2, %c0_3, %c0_4], %2 {strides = array<i32>} : memref<2x12x16xf32, #tpu.memory_space<vmem>>, vector<2x2x16xf32>,
    %c0_5 = arith.constant 0 : index
    %c10 = arith.constant 10 : index
    %c0_6 = arith.constant 0 : index
    %4 = vector.load %arg20[%c0_5, %c10, %c0_6] : memref<2x12x16xf32, #tpu.memory_space<vmem>>, vector<2x2x16xf32>
    tpu.vector_store %arg20[%c0_5, %c10, %c0_6], %2 {strides = array<i32>} : memref<2x12x16xf32, #tpu.memory_space<vmem>>, vector<2x2x16xf32>,
    %c0_7 = arith.constant 0 : index
    %c2 = arith.constant 2 : index
    %c0_8 = arith.constant 0 : index
    %5 = vector.load %arg20[%c0_7, %c2, %c0_8] : memref<2x12x16xf32, #tpu.memory_space<vmem>>, vector<2x8x16xf32>
    tpu.vector_store %arg20[%c0_7, %c2, %c0_8], %0 {strides = array<i32>} : memref<2x12x16xf32, #tpu.memory_space<vmem>>, vector<2x8x16xf32>,
    %c0_9 = arith.constant 0 : index
    %c0_10 = arith.constant 0 : index
    %c0_11 = arith.constant 0 : index
    %6 = vector.load %arg20[%c0_9, %c0_10, %c0_11] : memref<2x12x16xf32, #tpu.memory_space<vmem>>, vector<2x8x16xf32>
    %7 = vector.shape_cast %6 : vector<2x8x16xf32> to vector<16x16xf32>
    %c0_12 = arith.constant 0 : index
    %c0_13 = arith.constant 0 : index
    %8 = vector.load %arg1[%c0_12, %c0_13] : memref<64x64xbf16, #tpu.memory_space<vmem>>, vector<16x64xbf16>
    %9 = arith.truncf %7 : vector<16x16xf32> to vector<16x16xbf16>
    %cst_14 = arith.constant dense<0.000000e+00> : vector<16x64xf32>
    %10 = tpu.matmul %9, %8, %cst_14 {dimension_numbers = #tpu.dot_dimension_numbers<[1], [0], [0], [1], [0, 0, 1, 1], [], []>} : vector<16x16xbf16>, vector<16x64xbf16>, vector<16x64xf32> -> vector<16x64xf32>
    %c0_15 = arith.constant 0 : index
    %c1 = arith.constant 1 : index
    %c0_16 = arith.constant 0 : index
    %11 = vector.load %arg20[%c0_15, %c1, %c0_16] : memref<2x12x16xf32, #tpu.memory_space<vmem>>, vector<2x8x16xf32>
    %12 = vector.shape_cast %11 : vector<2x8x16xf32> to vector<16x16xf32>
    %c16 = arith.constant 16 : index
    %c0_17 = arith.constant 0 : index
    %13 = vector.load %arg1[%c16, %c0_17] : memref<64x64xbf16, #tpu.memory_space<vmem>>, vector<16x64xbf16>
    %14 = arith.truncf %12 : vector<16x16xf32> to vector<16x16xbf16>
    %cst_18 = arith.constant dense<0.000000e+00> : vector<16x64xf32>
    %15 = tpu.matmul %14, %13, %cst_18 {dimension_numbers = #tpu.dot_dimension_numbers<[1], [0], [0], [1], [0, 0, 1, 1], [], []>} : vector<16x16xbf16>, vector<16x64xbf16>, vector<16x64xf32> -> vector<16x64xf32>
    %16 = arith.addf %10, %15 : vector<16x64xf32>
    %c0_19 = arith.constant 0 : index
    %c2_20 = arith.constant 2 : index
    %c0_21 = arith.constant 0 : index
    %17 = vector.load %arg20[%c0_19, %c2_20, %c0_21] : memref<2x12x16xf32, #tpu.memory_space<vmem>>, vector<2x8x16xf32>
    %18 = vector.shape_cast %17 : vector<2x8x16xf32> to vector<16x16xf32>
    %c32 = arith.constant 32 : index
    %c0_22 = arith.constant 0 : index
    %19 = vector.load %arg1[%c32, %c0_22] : memref<64x64xbf16, #tpu.memory_space<vmem>>, vector<16x64xbf16>
    %20 = arith.truncf %18 : vector<16x16xf32> to vector<16x16xbf16>
    %cst_23 = arith.constant dense<0.000000e+00> : vector<16x64xf32>
    %21 = tpu.matmul %20, %19, %cst_23 {dimension_numbers = #tpu.dot_dimension_numbers<[1], [0], [0], [1], [0, 0, 1, 1], [], []>} : vector<16x16xbf16>, vector<16x64xbf16>, vector<16x64xf32> -> vector<16x64xf32>
    %22 = arith.addf %16, %21 : vector<16x64xf32>
    %c0_24 = arith.constant 0 : index
    %c3 = arith.constant 3 : index
    %c0_25 = arith.constant 0 : index
    %23 = vector.load %arg20[%c0_24, %c3, %c0_25] : memref<2x12x16xf32, #tpu.memory_space<vmem>>, vector<2x8x16xf32>
    %24 = vector.shape_cast %23 : vector<2x8x16xf32> to vector<16x16xf32>
    %c48 = arith.constant 48 : index
    %c0_26 = arith.constant 0 : index
    %25 = vector.load %arg1[%c48, %c0_26] : memref<64x64xbf16, #tpu.memory_space<vmem>>, vector<16x64xbf16>
    %26 = arith.truncf %24 : vector<16x16xf32> to vector<16x16xbf16>
    %cst_27 = arith.constant dense<0.000000e+00> : vector<16x64xf32>
    %27 = tpu.matmul %26, %25, %cst_27 {dimension_numbers = #tpu.dot_dimension_numbers<[1], [0], [0], [1], [0, 0, 1, 1], [], []>} : vector<16x16xbf16>, vector<16x64xbf16>, vector<16x64xf32> -> vector<16x64xf32>
    %28 = arith.addf %22, %27 : vector<16x64xf32>
    %cst_28 = arith.constant 0.000000e+00 : f32
    %29 = vector.broadcast %cst_28 : f32 to vector<16x64xf32>
    %30 = arith.maximumf %28, %29 : vector<16x64xf32>
    %c0_29 = arith.constant 0 : index
    %c0_30 = arith.constant 0 : index
    %31 = vector.load %arg2[%c0_29, %c0_30] : memref<1x64xf32, #tpu.memory_space<vmem>>, vector<1x64xf32>
    %c0_31 = arith.constant 0 : index
    %c0_32 = arith.constant 0 : index
    %32 = vector.load %arg3[%c0_31, %c0_32] : memref<1x64xf32, #tpu.memory_space<vmem>>, vector<1x64xf32>
    %cst_33 = arith.constant dense<0.000000e+00> : vector<64xf32>
    %33 = vector.multi_reduction <add>, %30, %cst_33 [0] : vector<16x64xf32> to vector<64xf32>
    %34 = vector.shape_cast %33 : vector<64xf32> to vector<1x64xf32>
    %cst_34 = arith.constant 1.600000e+01 : f32
    %35 = vector.broadcast %cst_34 : f32 to vector<1x64xf32>
    %36 = arith.divf %34, %35 : vector<1x64xf32>
    %37 = arith.mulf %30, %30 : vector<16x64xf32>
    %cst_35 = arith.constant dense<0.000000e+00> : vector<64xf32>
    %38 = vector.multi_reduction <add>, %37, %cst_35 [0] : vector<16x64xf32> to vector<64xf32>
    %39 = vector.shape_cast %38 : vector<64xf32> to vector<1x64xf32>
    %cst_36 = arith.constant 1.600000e+01 : f32
    %40 = vector.broadcast %cst_36 : f32 to vector<1x64xf32>
    %41 = arith.divf %39, %40 : vector<1x64xf32>
    %42 = arith.mulf %36, %36 : vector<1x64xf32>
    %43 = arith.subf %41, %42 : vector<1x64xf32>
    %44 = vector.broadcast %36 : vector<1x64xf32> to vector<16x64xf32>
    %45 = arith.subf %30, %44 : vector<16x64xf32>
    %cst_37 = arith.constant 9.99999974E-6 : f32
    %46 = vector.broadcast %cst_37 : f32 to vector<1x64xf32>
    %47 = arith.addf %43, %46 : vector<1x64xf32>
    %48 = math.rsqrt %47 : vector<1x64xf32>
    %49 = vector.broadcast %48 : vector<1x64xf32> to vector<16x64xf32>
    %50 = arith.mulf %45, %49 : vector<16x64xf32>
    %51 = vector.broadcast %31 : vector<1x64xf32> to vector<16x64xf32>
    %52 = arith.mulf %50, %51 : vector<16x64xf32>
    %53 = vector.broadcast %32 : vector<1x64xf32> to vector<16x64xf32>
    %54 = arith.addf %52, %53 : vector<16x64xf32>
    %55 = vector.shape_cast %54 : vector<16x64xf32> to vector<2x8x64xf32>
    %56 = vector.extract_strided_slice %55 {offsets = [0, 0, 0], sizes = [2, 1, 64], strides = [1, 1, 1]} : vector<2x8x64xf32> to vector<2x1x64xf32>
    %57 = vector.extract_strided_slice %55 {offsets = [0, 0, 0], sizes = [2, 7, 64], strides = [1, 1, 1]} : vector<2x8x64xf32> to vector<2x7x64xf32>
    %58 = tpu.concatenate %56, %57 in 1 : vector<2x1x64xf32>, vector<2x7x64xf32> -> vector<2x8x64xf32>
    %59 = arith.maximumf %55, %58 : vector<2x8x64xf32>
    %cst_38 = arith.constant 0.000000e+00 : f32
    %60 = vector.broadcast %cst_38 : f32 to vector<2x1x64xf32>
    %c0_39 = arith.constant 0 : index
    %c0_40 = arith.constant 0 : index
    %c0_41 = arith.constant 0 : index
    %61 = vector.load %arg21[%c0_39, %c0_40, %c0_41] : memref<2x10x64xf32, #tpu.memory_space<vmem>>, vector<2x1x64xf32>
    tpu.vector_store %arg21[%c0_39, %c0_40, %c0_41], %60 {strides = array<i32>} : memref<2x10x64xf32, #tpu.memory_space<vmem>>, vector<2x1x64xf32>,
    %c0_42 = arith.constant 0 : index
    %c9 = arith.constant 9 : index
    %c0_43 = arith.constant 0 : index
    %62 = vector.load %arg21[%c0_42, %c9, %c0_43] : memref<2x10x64xf32, #tpu.memory_space<vmem>>, vector<2x1x64xf32>
    tpu.vector_store %arg21[%c0_42, %c9, %c0_43], %60 {strides = array<i32>} : memref<2x10x64xf32, #tpu.memory_space<vmem>>, vector<2x1x64xf32>,
    %c0_44 = arith.constant 0 : index
    %c1_45 = arith.constant 1 : index
    %c0_46 = arith.constant 0 : index
    %63 = vector.load %arg21[%c0_44, %c1_45, %c0_46] : memref<2x10x64xf32, #tpu.memory_space<vmem>>, vector<2x8x64xf32>
    tpu.vector_store %arg21[%c0_44, %c1_45, %c0_46], %59 {strides = array<i32>} : memref<2x10x64xf32, #tpu.memory_space<vmem>>, vector<2x8x64xf32>,
    %c0_47 = arith.constant 0 : index
    %c0_48 = arith.constant 0 : index
    %c0_49 = arith.constant 0 : index
    %64 = vector.load %arg21[%c0_47, %c0_48, %c0_49] : memref<2x10x64xf32, #tpu.memory_space<vmem>>, vector<2x8x64xf32>
    %65 = vector.shape_cast %64 : vector<2x8x64xf32> to vector<16x64xf32>
    %c0_50 = arith.constant 0 : index
    %c0_51 = arith.constant 0 : index
    %66 = vector.load %arg4[%c0_50, %c0_51] : memref<192x32xbf16, #tpu.memory_space<vmem>>, vector<64x32xbf16>
    %67 = arith.truncf %65 : vector<16x64xf32> to vector<16x64xbf16>
    %cst_52 = arith.constant dense<0.000000e+00> : vector<16x32xf32>
    %68 = tpu.matmul %67, %66, %cst_52 {dimension_numbers = #tpu.dot_dimension_numbers<[1], [0], [0], [1], [0, 0, 1, 1], [], []>} : vector<16x64xbf16>, vector<64x32xbf16>, vector<16x32xf32> -> vector<16x32xf32>
    %c0_53 = arith.constant 0 : index
    %c1_54 = arith.constant 1 : index
    %c0_55 = arith.constant 0 : index
    %69 = vector.load %arg21[%c0_53, %c1_54, %c0_55] : memref<2x10x64xf32, #tpu.memory_space<vmem>>, vector<2x8x64xf32>
    %70 = vector.shape_cast %69 : vector<2x8x64xf32> to vector<16x64xf32>
    %c64 = arith.constant 64 : index
    %c0_56 = arith.constant 0 : index
    %71 = vector.load %arg4[%c64, %c0_56] : memref<192x32xbf16, #tpu.memory_space<vmem>>, vector<64x32xbf16>
    %72 = arith.truncf %70 : vector<16x64xf32> to vector<16x64xbf16>
    %cst_57 = arith.constant dense<0.000000e+00> : vector<16x32xf32>
    %73 = tpu.matmul %72, %71, %cst_57 {dimension_numbers = #tpu.dot_dimension_numbers<[1], [0], [0], [1], [0, 0, 1, 1], [], []>} : vector<16x64xbf16>, vector<64x32xbf16>, vector<16x32xf32> -> vector<16x32xf32>
    %74 = arith.addf %68, %73 : vector<16x32xf32>
    %c0_58 = arith.constant 0 : index
    %c2_59 = arith.constant 2 : index
    %c0_60 = arith.constant 0 : index
    %75 = vector.load %arg21[%c0_58, %c2_59, %c0_60] : memref<2x10x64xf32, #tpu.memory_space<vmem>>, vector<2x8x64xf32>
    %76 = vector.shape_cast %75 : vector<2x8x64xf32> to vector<16x64xf32>
    %c128 = arith.constant 128 : index
    %c0_61 = arith.constant 0 : index
    %77 = vector.load %arg4[%c128, %c0_61] : memref<192x32xbf16, #tpu.memory_space<vmem>>, vector<64x32xbf16>
    %78 = arith.truncf %76 : vector<16x64xf32> to vector<16x64xbf16>
    %cst_62 = arith.constant dense<0.000000e+00> : vector<16x32xf32>
    %79 = tpu.matmul %78, %77, %cst_62 {dimension_numbers = #tpu.dot_dimension_numbers<[1], [0], [0], [1], [0, 0, 1, 1], [], []>} : vector<16x64xbf16>, vector<64x32xbf16>, vector<16x32xf32> -> vector<16x32xf32>
    %80 = arith.addf %74, %79 : vector<16x32xf32>
    %cst_63 = arith.constant 0.000000e+00 : f32
    %81 = vector.broadcast %cst_63 : f32 to vector<16x32xf32>
    %82 = arith.maximumf %80, %81 : vector<16x32xf32>
    %c0_64 = arith.constant 0 : index
    %c0_65 = arith.constant 0 : index
    %83 = vector.load %arg5[%c0_64, %c0_65] : memref<1x32xf32, #tpu.memory_space<vmem>>, vector<1x32xf32>
    %c0_66 = arith.constant 0 : index
    %c0_67 = arith.constant 0 : index
    %84 = vector.load %arg6[%c0_66, %c0_67] : memref<1x32xf32, #tpu.memory_space<vmem>>, vector<1x32xf32>
    %cst_68 = arith.constant dense<0.000000e+00> : vector<32xf32>
    %85 = vector.multi_reduction <add>, %82, %cst_68 [0] : vector<16x32xf32> to vector<32xf32>
    %86 = vector.shape_cast %85 : vector<32xf32> to vector<1x32xf32>
    %cst_69 = arith.constant 1.600000e+01 : f32
    %87 = vector.broadcast %cst_69 : f32 to vector<1x32xf32>
    %88 = arith.divf %86, %87 : vector<1x32xf32>
    %89 = arith.mulf %82, %82 : vector<16x32xf32>
    %cst_70 = arith.constant dense<0.000000e+00> : vector<32xf32>
    %90 = vector.multi_reduction <add>, %89, %cst_70 [0] : vector<16x32xf32> to vector<32xf32>
    %91 = vector.shape_cast %90 : vector<32xf32> to vector<1x32xf32>
    %cst_71 = arith.constant 1.600000e+01 : f32
    %92 = vector.broadcast %cst_71 : f32 to vector<1x32xf32>
    %93 = arith.divf %91, %92 : vector<1x32xf32>
    %94 = arith.mulf %88, %88 : vector<1x32xf32>
    %95 = arith.subf %93, %94 : vector<1x32xf32>
    %96 = vector.broadcast %88 : vector<1x32xf32> to vector<16x32xf32>
    %97 = arith.subf %82, %96 : vector<16x32xf32>
    %cst_72 = arith.constant 9.99999974E-6 : f32
    %98 = vector.broadcast %cst_72 : f32 to vector<1x32xf32>
    %99 = arith.addf %95, %98 : vector<1x32xf32>
    %100 = math.rsqrt %99 : vector<1x32xf32>
    %101 = vector.broadcast %100 : vector<1x32xf32> to vector<16x32xf32>
    %102 = arith.mulf %97, %101 : vector<16x32xf32>
    %103 = vector.broadcast %83 : vector<1x32xf32> to vector<16x32xf32>
    %104 = arith.mulf %102, %103 : vector<16x32xf32>
    %105 = vector.broadcast %84 : vector<1x32xf32> to vector<16x32xf32>
    %106 = arith.addf %104, %105 : vector<16x32xf32>
    %cst_73 = arith.constant 0.000000e+00 : f32
    %107 = vector.broadcast %cst_73 : f32 to vector<2x1x32xf32>
    %c0_74 = arith.constant 0 : index
    %c0_75 = arith.constant 0 : index
    %c0_76 = arith.constant 0 : index
    %108 = vector.load %arg22[%c0_74, %c0_75, %c0_76] : memref<2x10x32xf32, #tpu.memory_space<vmem>>, vector<2x1x32xf32>
    tpu.vector_store %arg22[%c0_74, %c0_75, %c0_76], %107 {strides = array<i32>} : memref<2x10x32xf32, #tpu.memory_space<vmem>>, vector<2x1x32xf32>,
    %c0_77 = arith.constant 0 : index
    %c9_78 = arith.constant 9 : index
    %c0_79 = arith.constant 0 : index
    %109 = vector.load %arg22[%c0_77, %c9_78, %c0_79] : memref<2x10x32xf32, #tpu.memory_space<vmem>>, vector<2x1x32xf32>
    tpu.vector_store %arg22[%c0_77, %c9_78, %c0_79], %107 {strides = array<i32>} : memref<2x10x32xf32, #tpu.memory_space<vmem>>, vector<2x1x32xf32>,
    %110 = vector.shape_cast %106 : vector<16x32xf32> to vector<2x8x32xf32>
    %c0_80 = arith.constant 0 : index
    %c1_81 = arith.constant 1 : index
    %c0_82 = arith.constant 0 : index
    %111 = vector.load %arg22[%c0_80, %c1_81, %c0_82] : memref<2x10x32xf32, #tpu.memory_space<vmem>>, vector<2x8x32xf32>
    tpu.vector_store %arg22[%c0_80, %c1_81, %c0_82], %110 {strides = array<i32>} : memref<2x10x32xf32, #tpu.memory_space<vmem>>, vector<2x8x32xf32>,
    %c0_83 = arith.constant 0 : index
    %c0_84 = arith.constant 0 : index
    %c0_85 = arith.constant 0 : index
    %112 = vector.load %arg22[%c0_83, %c0_84, %c0_85] : memref<2x10x32xf32, #tpu.memory_space<vmem>>, vector<2x8x32xf32>
    %113 = vector.shape_cast %112 : vector<2x8x32xf32> to vector<16x32xf32>
    %c0_86 = arith.constant 0 : index
    %c0_87 = arith.constant 0 : index
    %114 = vector.load %arg7[%c0_86, %c0_87] : memref<96x32xbf16, #tpu.memory_space<vmem>>, vector<32x32xbf16>
    %115 = arith.truncf %113 : vector<16x32xf32> to vector<16x32xbf16>
    %cst_88 = arith.constant dense<0.000000e+00> : vector<16x32xf32>
    %116 = tpu.matmul %115, %114, %cst_88 {dimension_numbers = #tpu.dot_dimension_numbers<[1], [0], [0], [1], [0, 0, 1, 1], [], []>} : vector<16x32xbf16>, vector<32x32xbf16>, vector<16x32xf32> -> vector<16x32xf32>
    %c0_89 = arith.constant 0 : index
    %c1_90 = arith.constant 1 : index
    %c0_91 = arith.constant 0 : index
    %117 = vector.load %arg22[%c0_89, %c1_90, %c0_91] : memref<2x10x32xf32, #tpu.memory_space<vmem>>, vector<2x8x32xf32>
    %118 = vector.shape_cast %117 : vector<2x8x32xf32> to vector<16x32xf32>
    %c32_92 = arith.constant 32 : index
    %c0_93 = arith.constant 0 : index
    %119 = vector.load %arg7[%c32_92, %c0_93] : memref<96x32xbf16, #tpu.memory_space<vmem>>, vector<32x32xbf16>
    %120 = arith.truncf %118 : vector<16x32xf32> to vector<16x32xbf16>
    %cst_94 = arith.constant dense<0.000000e+00> : vector<16x32xf32>
    %121 = tpu.matmul %120, %119, %cst_94 {dimension_numbers = #tpu.dot_dimension_numbers<[1], [0], [0], [1], [0, 0, 1, 1], [], []>} : vector<16x32xbf16>, vector<32x32xbf16>, vector<16x32xf32> -> vector<16x32xf32>
    %122 = arith.addf %116, %121 : vector<16x32xf32>
    %c0_95 = arith.constant 0 : index
    %c2_96 = arith.constant 2 : index
    %c0_97 = arith.constant 0 : index
    %123 = vector.load %arg22[%c0_95, %c2_96, %c0_97] : memref<2x10x32xf32, #tpu.memory_space<vmem>>, vector<2x8x32xf32>
    %124 = vector.shape_cast %123 : vector<2x8x32xf32> to vector<16x32xf32>
    %c64_98 = arith.constant 64 : index
    %c0_99 = arith.constant 0 : index
    %125 = vector.load %arg7[%c64_98, %c0_99] : memref<96x32xbf16, #tpu.memory_space<vmem>>, vector<32x32xbf16>
    %126 = arith.truncf %124 : vector<16x32xf32> to vector<16x32xbf16>
    %cst_100 = arith.constant dense<0.000000e+00> : vector<16x32xf32>
    %127 = tpu.matmul %126, %125, %cst_100 {dimension_numbers = #tpu.dot_dimension_numbers<[1], [0], [0], [1], [0, 0, 1, 1], [], []>} : vector<16x32xbf16>, vector<32x32xbf16>, vector<16x32xf32> -> vector<16x32xf32>
    %128 = arith.addf %122, %127 : vector<16x32xf32>
    %c0_101 = arith.constant 0 : index
    %c0_102 = arith.constant 0 : index
    %129 = vector.load %arg8[%c0_101, %c0_102] : memref<1x32xf32, #tpu.memory_space<vmem>>, vector<1x32xf32>
    %c0_103 = arith.constant 0 : index
    %c0_104 = arith.constant 0 : index
    %130 = vector.load %arg9[%c0_103, %c0_104] : memref<1x32xf32, #tpu.memory_space<vmem>>, vector<1x32xf32>
    %cst_105 = arith.constant dense<0.000000e+00> : vector<32xf32>
    %131 = vector.multi_reduction <add>, %128, %cst_105 [0] : vector<16x32xf32> to vector<32xf32>
    %132 = vector.shape_cast %131 : vector<32xf32> to vector<1x32xf32>
    %cst_106 = arith.constant 1.600000e+01 : f32
    %133 = vector.broadcast %cst_106 : f32 to vector<1x32xf32>
    %134 = arith.divf %132, %133 : vector<1x32xf32>
    %135 = arith.mulf %128, %128 : vector<16x32xf32>
    %cst_107 = arith.constant dense<0.000000e+00> : vector<32xf32>
    %136 = vector.multi_reduction <add>, %135, %cst_107 [0] : vector<16x32xf32> to vector<32xf32>
    %137 = vector.shape_cast %136 : vector<32xf32> to vector<1x32xf32>
    %cst_108 = arith.constant 1.600000e+01 : f32
    %138 = vector.broadcast %cst_108 : f32 to vector<1x32xf32>
    %139 = arith.divf %137, %138 : vector<1x32xf32>
    %140 = arith.mulf %134, %134 : vector<1x32xf32>
    %141 = arith.subf %139, %140 : vector<1x32xf32>
    %142 = vector.broadcast %134 : vector<1x32xf32> to vector<16x32xf32>
    %143 = arith.subf %128, %142 : vector<16x32xf32>
    %cst_109 = arith.constant 9.99999974E-6 : f32
    %144 = vector.broadcast %cst_109 : f32 to vector<1x32xf32>
    %145 = arith.addf %141, %144 : vector<1x32xf32>
    %146 = math.rsqrt %145 : vector<1x32xf32>
    %147 = vector.broadcast %146 : vector<1x32xf32> to vector<16x32xf32>
    %148 = arith.mulf %143, %147 : vector<16x32xf32>
    %149 = vector.broadcast %129 : vector<1x32xf32> to vector<16x32xf32>
    %150 = arith.mulf %148, %149 : vector<16x32xf32>
    %151 = vector.broadcast %130 : vector<1x32xf32> to vector<16x32xf32>
    %152 = arith.addf %150, %151 : vector<16x32xf32>
    %c0_110 = arith.constant 0 : index
    %c0_111 = arith.constant 0 : index
    %153 = vector.load %arg10[%c0_110, %c0_111] : memref<32x16xbf16, #tpu.memory_space<vmem>>, vector<32x16xbf16>
    %154 = arith.truncf %152 : vector<16x32xf32> to vector<16x32xbf16>
    %cst_112 = arith.constant dense<0.000000e+00> : vector<16x16xf32>
    %155 = tpu.matmul %154, %153, %cst_112 {dimension_numbers = #tpu.dot_dimension_numbers<[1], [0], [0], [1], [0, 0, 1, 1], [], []>} : vector<16x32xbf16>, vector<32x16xbf16>, vector<16x16xf32> -> vector<16x16xf32>
    %156 = arith.addf %155, %1 : vector<16x16xf32>
    %c0_113 = arith.constant 0 : index
    %c0_114 = arith.constant 0 : index
    %157 = vector.load %arg11[%c0_113, %c0_114] : memref<16x32xbf16, #tpu.memory_space<vmem>>, vector<16x32xbf16>
    %c0_115 = arith.constant 0 : index
    %c0_116 = arith.constant 0 : index
    %158 = vector.load %arg12[%c0_115, %c0_116] : memref<1x32xf32, #tpu.memory_space<vmem>>, vector<1x32xf32>
    %159 = vector.shape_cast %158 : vector<1x32xf32> to vector<1x32xf32>
    %160 = vector.broadcast %159 : vector<1x32xf32> to vector<16x32xf32>
    %161 = arith.truncf %156 : vector<16x16xf32> to vector<16x16xbf16>
    %cst_117 = arith.constant dense<0.000000e+00> : vector<16x32xf32>
    %162 = tpu.matmul %161, %157, %cst_117 {dimension_numbers = #tpu.dot_dimension_numbers<[1], [0], [0], [1], [0, 0, 1, 1], [], []>} : vector<16x16xbf16>, vector<16x32xbf16>, vector<16x32xf32> -> vector<16x32xf32>
    %163 = arith.addf %162, %160 : vector<16x32xf32>
    %164 = vector.extract_strided_slice %163 {offsets = [0, 0], sizes = [16, 16], strides = [1, 1]} : vector<16x32xf32> to vector<16x16xf32>
    %cst_118 = arith.constant 0.000000e+00 : f32
    %165 = vector.broadcast %cst_118 : f32 to vector<16x16xf32>
    %166 = arith.maximumf %164, %165 : vector<16x16xf32>
    %167 = vector.extract_strided_slice %163 {offsets = [0, 16], sizes = [16, 16], strides = [1, 1]} : vector<16x32xf32> to vector<16x16xf32>
    %168 = arith.negf %167 : vector<16x16xf32>
    %169 = math.exp %168 : vector<16x16xf32>
    %cst_119 = arith.constant 1.000000e+00 : f32
    %170 = vector.broadcast %cst_119 : f32 to vector<16x16xf32>
    %171 = arith.addf %170, %169 : vector<16x16xf32>
    %172 = arith.divf %170, %171 : vector<16x16xf32>
    %173 = arith.subf %166, %156 : vector<16x16xf32>
    %174 = arith.mulf %172, %173 : vector<16x16xf32>
    %175 = arith.addf %156, %174 : vector<16x16xf32>
    %176 = arith.truncf %175 : vector<16x16xf32> to vector<16x16xbf16>
    %cst_120 = arith.constant dense<0.000000e+00> : vector<16x32xf32>
    %177 = tpu.matmul %176, %157, %cst_120 {dimension_numbers = #tpu.dot_dimension_numbers<[1], [0], [0], [1], [0, 0, 1, 1], [], []>} : vector<16x16xbf16>, vector<16x32xbf16>, vector<16x32xf32> -> vector<16x32xf32>
    %178 = arith.addf %177, %160 : vector<16x32xf32>
    %179 = vector.extract_strided_slice %178 {offsets = [0, 0], sizes = [16, 16], strides = [1, 1]} : vector<16x32xf32> to vector<16x16xf32>
    %cst_121 = arith.constant 0.000000e+00 : f32
    %180 = vector.broadcast %cst_121 : f32 to vector<16x16xf32>
    %181 = arith.maximumf %179, %180 : vector<16x16xf32>
    %182 = vector.extract_strided_slice %178 {offsets = [0, 16], sizes = [16, 16], strides = [1, 1]} : vector<16x32xf32> to vector<16x16xf32>
    %183 = arith.negf %182 : vector<16x16xf32>
    %184 = math.exp %183 : vector<16x16xf32>
    %cst_122 = arith.constant 1.000000e+00 : f32
    %185 = vector.broadcast %cst_122 : f32 to vector<16x16xf32>
    %186 = arith.addf %185, %184 : vector<16x16xf32>
    %187 = arith.divf %185, %186 : vector<16x16xf32>
    %188 = arith.subf %181, %175 : vector<16x16xf32>
    %189 = arith.mulf %187, %188 : vector<16x16xf32>
    %190 = arith.addf %175, %189 : vector<16x16xf32>
    %191 = arith.truncf %190 : vector<16x16xf32> to vector<16x16xbf16>
    %cst_123 = arith.constant dense<0.000000e+00> : vector<16x32xf32>
    %192 = tpu.matmul %191, %157, %cst_123 {dimension_numbers = #tpu.dot_dimension_numbers<[1], [0], [0], [1], [0, 0, 1, 1], [], []>} : vector<16x16xbf16>, vector<16x32xbf16>, vector<16x32xf32> -> vector<16x32xf32>
    %193 = arith.addf %192, %160 : vector<16x32xf32>
    %194 = vector.extract_strided_slice %193 {offsets = [0, 0], sizes = [16, 16], strides = [1, 1]} : vector<16x32xf32> to vector<16x16xf32>
    %cst_124 = arith.constant 0.000000e+00 : f32
    %195 = vector.broadcast %cst_124 : f32 to vector<16x16xf32>
    %196 = arith.maximumf %194, %195 : vector<16x16xf32>
    %197 = vector.extract_strided_slice %193 {offsets = [0, 16], sizes = [16, 16], strides = [1, 1]} : vector<16x32xf32> to vector<16x16xf32>
    %198 = arith.negf %197 : vector<16x16xf32>
    %199 = math.exp %198 : vector<16x16xf32>
    %cst_125 = arith.constant 1.000000e+00 : f32
    %200 = vector.broadcast %cst_125 : f32 to vector<16x16xf32>
    %201 = arith.addf %200, %199 : vector<16x16xf32>
    %202 = arith.divf %200, %201 : vector<16x16xf32>
    %203 = arith.subf %196, %190 : vector<16x16xf32>
    %204 = arith.mulf %202, %203 : vector<16x16xf32>
    %205 = arith.addf %190, %204 : vector<16x16xf32>
    %206 = arith.truncf %205 : vector<16x16xf32> to vector<16x16xbf16>
    %cst_126 = arith.constant dense<0.000000e+00> : vector<16x32xf32>
    %207 = tpu.matmul %206, %157, %cst_126 {dimension_numbers = #tpu.dot_dimension_numbers<[1], [0], [0], [1], [0, 0, 1, 1], [], []>} : vector<16x16xbf16>, vector<16x32xbf16>, vector<16x32xf32> -> vector<16x32xf32>
    %208 = arith.addf %207, %160 : vector<16x32xf32>
    %209 = vector.extract_strided_slice %208 {offsets = [0, 0], sizes = [16, 16], strides = [1, 1]} : vector<16x32xf32> to vector<16x16xf32>
    %cst_127 = arith.constant 0.000000e+00 : f32
    %210 = vector.broadcast %cst_127 : f32 to vector<16x16xf32>
    %211 = arith.maximumf %209, %210 : vector<16x16xf32>
    %212 = vector.extract_strided_slice %208 {offsets = [0, 16], sizes = [16, 16], strides = [1, 1]} : vector<16x32xf32> to vector<16x16xf32>
    %213 = arith.negf %212 : vector<16x16xf32>
    %214 = math.exp %213 : vector<16x16xf32>
    %cst_128 = arith.constant 1.000000e+00 : f32
    %215 = vector.broadcast %cst_128 : f32 to vector<16x16xf32>
    %216 = arith.addf %215, %214 : vector<16x16xf32>
    %217 = arith.divf %215, %216 : vector<16x16xf32>
    %218 = arith.subf %211, %205 : vector<16x16xf32>
    %219 = arith.mulf %217, %218 : vector<16x16xf32>
    %220 = arith.addf %205, %219 : vector<16x16xf32>
    %c0_129 = arith.constant 0 : index
    %c0_130 = arith.constant 0 : index
    %221 = vector.load %arg13[%c0_129, %c0_130] : memref<16x96xbf16, #tpu.memory_space<vmem>>, vector<16x96xbf16>
    %222 = arith.truncf %220 : vector<16x16xf32> to vector<16x16xbf16>
    %cst_131 = arith.constant dense<0.000000e+00> : vector<16x96xf32>
    %223 = tpu.matmul %222, %221, %cst_131 {dimension_numbers = #tpu.dot_dimension_numbers<[1], [0], [0], [1], [0, 0, 1, 1], [], []>} : vector<16x16xbf16>, vector<16x96xbf16>, vector<16x96xf32> -> vector<16x96xf32>
    %c0_132 = arith.constant 0 : index
    %c0_133 = arith.constant 0 : index
    %224 = vector.load %arg14[%c0_132, %c0_133] : memref<1x96xf32, #tpu.memory_space<vmem>>, vector<1x96xf32>
    %225 = vector.broadcast %224 : vector<1x96xf32> to vector<16x96xf32>
    %226 = arith.addf %223, %225 : vector<16x96xf32>
    %227 = vector.extract_strided_slice %226 {offsets = [0, 0], sizes = [8, 48], strides = [1, 1]} : vector<16x96xf32> to vector<8x48xf32>
    %c0_134 = arith.constant 0 : index
    %c0_135 = arith.constant 0 : index
    %c0_136 = arith.constant 0 : index
    %228 = vector.load %arg23[%c0_134, %c0_135, %c0_136] : memref<8x2x48xf32, #tpu.memory_space<vmem>>, vector<8x1x48xf32>
    %229 = vector.shape_cast %228 : vector<8x1x48xf32> to vector<8x48xf32>
    %230 = vector.shape_cast %227 : vector<8x48xf32> to vector<8x1x48xf32>
    tpu.vector_store %arg23[%c0_134, %c0_135, %c0_136], %230 {strides = array<i32>} : memref<8x2x48xf32, #tpu.memory_space<vmem>>, vector<8x1x48xf32>,
    %231 = vector.extract_strided_slice %226 {offsets = [0, 48], sizes = [8, 48], strides = [1, 1]} : vector<16x96xf32> to vector<8x48xf32>
    %c0_137 = arith.constant 0 : index
    %c0_138 = arith.constant 0 : index
    %c0_139 = arith.constant 0 : index
    %232 = vector.load %arg24[%c0_137, %c0_138, %c0_139] : memref<8x2x48xf32, #tpu.memory_space<vmem>>, vector<8x1x48xf32>
    %233 = vector.shape_cast %232 : vector<8x1x48xf32> to vector<8x48xf32>
    %234 = vector.shape_cast %231 : vector<8x48xf32> to vector<8x1x48xf32>
    tpu.vector_store %arg24[%c0_137, %c0_138, %c0_139], %234 {strides = array<i32>} : memref<8x2x48xf32, #tpu.memory_space<vmem>>, vector<8x1x48xf32>,
    %235 = vector.extract_strided_slice %226 {offsets = [8, 0], sizes = [8, 48], strides = [1, 1]} : vector<16x96xf32> to vector<8x48xf32>
    %c0_140 = arith.constant 0 : index
    %c1_141 = arith.constant 1 : index
    %c0_142 = arith.constant 0 : index
    %236 = vector.load %arg23[%c0_140, %c1_141, %c0_142] : memref<8x2x48xf32, #tpu.memory_space<vmem>>, vector<8x1x48xf32>
    %237 = vector.shape_cast %236 : vector<8x1x48xf32> to vector<8x48xf32>
    %238 = vector.shape_cast %235 : vector<8x48xf32> to vector<8x1x48xf32>
    tpu.vector_store %arg23[%c0_140, %c1_141, %c0_142], %238 {strides = array<i32>} : memref<8x2x48xf32, #tpu.memory_space<vmem>>, vector<8x1x48xf32>,
    %239 = vector.extract_strided_slice %226 {offsets = [8, 48], sizes = [8, 48], strides = [1, 1]} : vector<16x96xf32> to vector<8x48xf32>
    %c0_143 = arith.constant 0 : index
    %c1_144 = arith.constant 1 : index
    %c0_145 = arith.constant 0 : index
    %240 = vector.load %arg24[%c0_143, %c1_144, %c0_145] : memref<8x2x48xf32, #tpu.memory_space<vmem>>, vector<8x1x48xf32>
    %241 = vector.shape_cast %240 : vector<8x1x48xf32> to vector<8x48xf32>
    %242 = vector.shape_cast %239 : vector<8x48xf32> to vector<8x1x48xf32>
    tpu.vector_store %arg24[%c0_143, %c1_144, %c0_145], %242 {strides = array<i32>} : memref<8x2x48xf32, #tpu.memory_space<vmem>>, vector<8x1x48xf32>,
    %c0_146 = arith.constant 0 : index
    %c0_147 = arith.constant 0 : index
    %243 = vector.load %arg15[%c0_146, %c0_147] : memref<16x48xf32, #tpu.memory_space<vmem>>, vector<16x48xf32>
    %c0_148 = arith.constant 0 : index
    %c0_149 = arith.constant 0 : index
    %244 = vector.load %arg16[%c0_148, %c0_149] : memref<16x48xf32, #tpu.memory_space<vmem>>, vector<16x48xf32>
    %c0_150 = arith.constant 0 : index
    %c0_151 = arith.constant 0 : index
    %245 = vector.load %arg17[%c0_150, %c0_151] : memref<1x48xf32, #tpu.memory_space<vmem>>, vector<1x48xf32>
    %246 = vector.shape_cast %245 : vector<1x48xf32> to vector<1x48xf32>
    %247 = vector.broadcast %246 : vector<1x48xf32> to vector<2x48xf32>
    %c0_152 = arith.constant 0 : index
    %c0_153 = arith.constant 0 : index
    %248 = vector.load %arg18[%c0_152, %c0_153] : memref<1x48xf32, #tpu.memory_space<vmem>>, vector<1x48xf32>
    %249 = vector.shape_cast %248 : vector<1x48xf32> to vector<1x48xf32>
    %250 = vector.broadcast %249 : vector<1x48xf32> to vector<2x48xf32>
    %cst_154 = arith.constant 0.000000e+00 : f32
    %251 = vector.broadcast %cst_154 : f32 to vector<2x16xf32>
    %c0_i32 = arith.constant 0 : i32
    %c8_i32 = arith.constant 8 : i32
    %252 = arith.addi %c0_i32, %c8_i32 : i32
    %c1_i32 = arith.constant 1 : i32
    %253:2 = scf.for %arg26 = %c0_i32 to %252 step %c1_i32 iter_args(%arg27 = %251, %arg28 = %251) -> (vector<2x16xf32>, vector<2x16xf32>)  : i32 {
      %264 = arith.index_cast %arg26 : i32 to index
      %c0_168 = arith.constant 0 : index
      %c0_169 = arith.constant 0 : index
      %265 = vector.load %arg23[%264, %c0_168, %c0_169] : memref<8x2x48xf32, #tpu.memory_space<vmem>>, vector<1x2x48xf32>
      %266 = vector.shape_cast %265 : vector<1x2x48xf32> to vector<2x48xf32>
      %c7_i32 = arith.constant 7 : i32
      %267 = arith.subi %c7_i32, %arg26 : i32
      %268 = arith.index_cast %267 : i32 to index
      %c0_170 = arith.constant 0 : index
      %c0_171 = arith.constant 0 : index
      %269 = vector.load %arg24[%268, %c0_170, %c0_171] : memref<8x2x48xf32, #tpu.memory_space<vmem>>, vector<1x2x48xf32>
      %270 = vector.shape_cast %269 : vector<1x2x48xf32> to vector<2x48xf32>
      %cst_172 = arith.constant dense<0.000000e+00> : vector<2x48xf32>
      %271 = tpu.matmul %arg27, %243, %cst_172 {dimension_numbers = #tpu.dot_dimension_numbers<[1], [0], [0], [1], [0, 0, 1, 1], [], []>} : vector<2x16xf32>, vector<16x48xf32>, vector<2x48xf32> -> vector<2x48xf32>
      %272 = arith.addf %271, %247 : vector<2x48xf32>
      %cst_173 = arith.constant dense<0.000000e+00> : vector<2x48xf32>
      %273 = tpu.matmul %arg28, %244, %cst_173 {dimension_numbers = #tpu.dot_dimension_numbers<[1], [0], [0], [1], [0, 0, 1, 1], [], []>} : vector<2x16xf32>, vector<16x48xf32>, vector<2x48xf32> -> vector<2x48xf32>
      %274 = arith.addf %273, %250 : vector<2x48xf32>
      %275 = vector.extract_strided_slice %266 {offsets = [0, 0], sizes = [2, 16], strides = [1, 1]} : vector<2x48xf32> to vector<2x16xf32>
      %276 = vector.extract_strided_slice %272 {offsets = [0, 0], sizes = [2, 16], strides = [1, 1]} : vector<2x48xf32> to vector<2x16xf32>
      %277 = arith.addf %275, %276 : vector<2x16xf32>
      %278 = arith.negf %277 : vector<2x16xf32>
      %279 = math.exp %278 : vector<2x16xf32>
      %cst_174 = arith.constant 1.000000e+00 : f32
      %280 = vector.broadcast %cst_174 : f32 to vector<2x16xf32>
      %281 = arith.addf %280, %279 : vector<2x16xf32>
      %282 = arith.divf %280, %281 : vector<2x16xf32>
      %283 = vector.extract_strided_slice %266 {offsets = [0, 16], sizes = [2, 16], strides = [1, 1]} : vector<2x48xf32> to vector<2x16xf32>
      %284 = vector.extract_strided_slice %272 {offsets = [0, 16], sizes = [2, 16], strides = [1, 1]} : vector<2x48xf32> to vector<2x16xf32>
      %285 = arith.addf %283, %284 : vector<2x16xf32>
      %286 = arith.negf %285 : vector<2x16xf32>
      %287 = math.exp %286 : vector<2x16xf32>
      %cst_175 = arith.constant 1.000000e+00 : f32
      %288 = vector.broadcast %cst_175 : f32 to vector<2x16xf32>
      %289 = arith.addf %288, %287 : vector<2x16xf32>
      %290 = arith.divf %288, %289 : vector<2x16xf32>
      %291 = vector.extract_strided_slice %266 {offsets = [0, 32], sizes = [2, 16], strides = [1, 1]} : vector<2x48xf32> to vector<2x16xf32>
      %292 = vector.extract_strided_slice %272 {offsets = [0, 32], sizes = [2, 16], strides = [1, 1]} : vector<2x48xf32> to vector<2x16xf32>
      %293 = arith.mulf %282, %292 : vector<2x16xf32>
      %294 = arith.addf %291, %293 : vector<2x16xf32>
      %295 = math.tanh %294 : vector<2x16xf32>
      %296 = arith.subf %arg27, %295 : vector<2x16xf32>
      %297 = arith.mulf %290, %296 : vector<2x16xf32>
      %298 = arith.addf %295, %297 : vector<2x16xf32>
      %299 = vector.extract_strided_slice %270 {offsets = [0, 0], sizes = [2, 16], strides = [1, 1]} : vector<2x48xf32> to vector<2x16xf32>
      %300 = vector.extract_strided_slice %274 {offsets = [0, 0], sizes = [2, 16], strides = [1, 1]} : vector<2x48xf32> to vector<2x16xf32>
      %301 = arith.addf %299, %300 : vector<2x16xf32>
      %302 = arith.negf %301 : vector<2x16xf32>
      %303 = math.exp %302 : vector<2x16xf32>
      %cst_176 = arith.constant 1.000000e+00 : f32
      %304 = vector.broadcast %cst_176 : f32 to vector<2x16xf32>
      %305 = arith.addf %304, %303 : vector<2x16xf32>
      %306 = arith.divf %304, %305 : vector<2x16xf32>
      %307 = vector.extract_strided_slice %270 {offsets = [0, 16], sizes = [2, 16], strides = [1, 1]} : vector<2x48xf32> to vector<2x16xf32>
      %308 = vector.extract_strided_slice %274 {offsets = [0, 16], sizes = [2, 16], strides = [1, 1]} : vector<2x48xf32> to vector<2x16xf32>
      %309 = arith.addf %307, %308 : vector<2x16xf32>
      %310 = arith.negf %309 : vector<2x16xf32>
      %311 = math.exp %310 : vector<2x16xf32>
      %cst_177 = arith.constant 1.000000e+00 : f32
      %312 = vector.broadcast %cst_177 : f32 to vector<2x16xf32>
      %313 = arith.addf %312, %311 : vector<2x16xf32>
      %314 = arith.divf %312, %313 : vector<2x16xf32>
      %315 = vector.extract_strided_slice %270 {offsets = [0, 32], sizes = [2, 16], strides = [1, 1]} : vector<2x48xf32> to vector<2x16xf32>
      %316 = vector.extract_strided_slice %274 {offsets = [0, 32], sizes = [2, 16], strides = [1, 1]} : vector<2x48xf32> to vector<2x16xf32>
      %317 = arith.mulf %306, %316 : vector<2x16xf32>
      %318 = arith.addf %315, %317 : vector<2x16xf32>
      %319 = math.tanh %318 : vector<2x16xf32>
      %320 = arith.subf %arg28, %319 : vector<2x16xf32>
      %321 = arith.mulf %314, %320 : vector<2x16xf32>
      %322 = arith.addf %319, %321 : vector<2x16xf32>
      %323 = vector.shape_cast %298 : vector<2x16xf32> to vector<1x2x16xf32>
      %324 = arith.index_cast %arg26 : i32 to index
      %c0_178 = arith.constant 0 : index
      %c0_179 = arith.constant 0 : index
      %325 = vector.load %arg25[%324, %c0_178, %c0_179] : memref<8x2x32xf32, #tpu.memory_space<vmem>>, vector<1x2x16xf32>
      tpu.vector_store %arg25[%324, %c0_178, %c0_179], %323 {strides = array<i32>} : memref<8x2x32xf32, #tpu.memory_space<vmem>>, vector<1x2x16xf32>,
      %326 = vector.shape_cast %322 : vector<2x16xf32> to vector<1x2x16xf32>
      %c7_i32_180 = arith.constant 7 : i32
      %327 = arith.subi %c7_i32_180, %arg26 : i32
      %328 = arith.index_cast %327 : i32 to index
      %c0_181 = arith.constant 0 : index
      %c16_182 = arith.constant 16 : index
      %329 = vector.load %arg25[%328, %c0_181, %c16_182] : memref<8x2x32xf32, #tpu.memory_space<vmem>>, vector<1x2x16xf32>
      tpu.vector_store %arg25[%328, %c0_181, %c16_182], %326 {strides = array<i32>} : memref<8x2x32xf32, #tpu.memory_space<vmem>>, vector<1x2x16xf32>,
      scf.yield %298, %322 : vector<2x16xf32>, vector<2x16xf32>
    }
    %c8_i32_155 = arith.constant 8 : i32
    %c0_156 = arith.constant 0 : index
    %c0_157 = arith.constant 0 : index
    %c0_158 = arith.constant 0 : index
    %254 = vector.load %arg25[%c0_156, %c0_157, %c0_158] : memref<8x2x32xf32, #tpu.memory_space<vmem>>, vector<8x1x32xf32>
    %255 = vector.shape_cast %254 : vector<8x1x32xf32> to vector<8x32xf32>
    %c0_159 = arith.constant 0 : index
    %c0_160 = arith.constant 0 : index
    %c0_161 = arith.constant 0 : index
    %256 = vector.load %arg19[%c0_159, %c0_160, %c0_161] : memref<2x8x32xf32, #tpu.memory_space<vmem>>, vector<1x8x32xf32>
    %257 = vector.shape_cast %256 : vector<1x8x32xf32> to vector<8x32xf32>
    %258 = vector.shape_cast %255 : vector<8x32xf32> to vector<1x8x32xf32>
    tpu.vector_store %arg19[%c0_159, %c0_160, %c0_161], %258 {strides = array<i32>} : memref<2x8x32xf32, #tpu.memory_space<vmem>>, vector<1x8x32xf32>,
    %c0_162 = arith.constant 0 : index
    %c1_163 = arith.constant 1 : index
    %c0_164 = arith.constant 0 : index
    %259 = vector.load %arg25[%c0_162, %c1_163, %c0_164] : memref<8x2x32xf32, #tpu.memory_space<vmem>>, vector<8x1x32xf32>
    %260 = vector.shape_cast %259 : vector<8x1x32xf32> to vector<8x32xf32>
    %c1_165 = arith.constant 1 : index
    %c0_166 = arith.constant 0 : index
    %c0_167 = arith.constant 0 : index
    %261 = vector.load %arg19[%c1_165, %c0_166, %c0_167] : memref<2x8x32xf32, #tpu.memory_space<vmem>>, vector<1x8x32xf32>
    %262 = vector.shape_cast %261 : vector<1x8x32xf32> to vector<8x32xf32>
    %263 = vector.shape_cast %260 : vector<8x32xf32> to vector<1x8x32xf32>
    tpu.vector_store %arg19[%c1_165, %c0_166, %c0_167], %263 {strides = array<i32>} : memref<2x8x32xf32, #tpu.memory_space<vmem>>, vector<1x8x32xf32>,
    return
  }
}

</mosaic_0001>

<bundles_post_ra>
// kernel: cbhg_forward.1
= control target key start
LH: loop header
LB: loop body
LE: loop exit
PB: predicated region body
PF: predicated region fallthrough
CT: control target
= control target key end

     0   :  { %s2986_s0 = inlined_call_operand.vmem [shape: f32[2,8,16], index: 0, kind: input, shape index: {}]   ;;  %s2987_s1 = inlined_call_operand.vmem [shape: bf16[64,64], index: 1, kind: input, shape index: {}]   ;;  %s2988_s2 = inlined_call_operand.vmem [shape: f32[1,64], index: 2, kind: input, shape index: {}]   ;;  %s2989_s3 = inlined_call_operand.vmem [shape: f32[1,64], index: 3, kind: input, shape index: {}]   ;;  %s2990_s4 = inlined_call_operand.vmem [shape: bf16[192,32], index: 4, kind: input, shape index: {}]   ;;  %s2991_s5 = inlined_call_operand.vmem [shape: f32[1,32], index: 5, kind: input, shape index: {}]   ;;  %s2992_s6 = inlined_call_operand.vmem [shape: f32[1,32], index: 6, kind: input, shape index: {}]   ;;  %s2993_s7 = inlined_call_operand.vmem [shape: bf16[96,32], index: 7, kind: input, shape index: {}]   ;;  %s2994_s8 = inlined_call_operand.vmem [shape: f32[1,32], index: 8, kind: input, shape index: {}]   ;;  %s2995_s9 = inlined_call_operand.vmem [shape: f32[1,32], index: 9, kind: input, shape index: {}]   ;;  %s2996_s10 = inlined_call_operand.vmem [shape: bf16[32,16], index: 10, kind: input, shape index: {}]   ;;  %s2997_s11 = inlined_call_operand.vmem [shape: bf16[16,32], index: 11, kind: input, shape index: {}]   ;;  %s2998_s12 = inlined_call_operand.vmem [shape: f32[1,32], index: 12, kind: input, shape index: {}]   ;;  %s2999_s13 = inlined_call_operand.vmem [shape: bf16[16,96], index: 13, kind: input, shape index: {}]   ;;  %s3000_s14 = inlined_call_operand.vmem [shape: f32[1,96], index: 14, kind: input, shape index: {}]   ;;  %s3001_s15 = inlined_call_operand.vmem [shape: f32[16,48], index: 15, kind: input, shape index: {}]   ;;  %s3002_s16 = inlined_call_operand.vmem [shape: f32[16,48], index: 16, kind: input, shape index: {}]   ;;  %s3003_s17 = inlined_call_operand.vmem [shape: f32[1,48], index: 17, kind: input, shape index: {}]   ;;  %s3004_s18 = inlined_call_operand.vmem [shape: f32[1,48], index: 18, kind: input, shape index: {}]   ;;  %s3005_s19 = inlined_call_operand.hbm [shape: f32[2,8,32], index: 19, kind: output, shape index: {}]  }
   0x1   :  { %3008 = sst [smem:[#allocation11_spill]] %s2986_s0 }
   0x2   :  { %3009 = sst [smem:[#allocation12_spill]] %s2987_s1 }
   0x3   :  { %3010 = sst [smem:[#allocation13_spill]] %s2988_s2 }
   0x4   :  { %3011 = sst [smem:[#allocation14_spill]] %s2989_s3 }
   0x5   :  { %24 = vsyncpa [#allocation9], 0  ;;  %s3012_s20 = sld [smem:[#allocation12_spill]]  ;;  %v2437_v1 = vmov 0.0   ;;  %s3013_s22 = sld [smem:[#allocation11_spill]]  ;;  %vm66_vm0 = vcmask 123904  }
   0x6   :  { %2103 = vmatprep.subr.bf16.mxu0 %v2437_v1  ;;  %2127 = vmatprep.subr.bf16.mxu1 %v2437_v1  ;;  %vm2438_vm1 = vmmov 0   ;;  %67 = vst.msk [vmem:[#allocation2] sm:$0x3] %vm66_vm0, %v2437_v1  ;;  %68 = vst.msk [vmem:[#allocation2 + $0x10] sm:$0x3] %vm66_vm0, %v2437_v1  ;;  %vm71_vm2 = vcmask 130048  }
   0x7   :  { %2105 = vmatprep.mubr.msk.bf16.mxu0 %vm2438_vm1, %v2437_v1  ;;  %69 = vst.msk [vmem:[#allocation2 + $0xa] sm:$0x3] %vm66_vm0, %v2437_v1  ;;  %70 = vst.msk [vmem:[#allocation2 + $0x1a] sm:$0x3] %vm66_vm0, %v2437_v1  ;;  %2135 = vmatprep.mubr.msk.bf16.mxu1 %vm2438_vm1, %v2437_v1  ;;  %v2317_v19 = vld [vmem:[%s2990_s4 + $0x20] sm:$0xff]   ;;  %v2318_v20 = vld [vmem:[%s2990_s4 + $0x28] sm:$0xff]  }
   0x8   :  { %2128 = vmatpush3.bf16.msra.mxu1 %v2317_v19  ;;  %v2319_v21 = vld [vmem:[%s2990_s4 + $0x30] sm:$0xff]   ;;  %vm361_vm3 = vcmask 516096   ;;  %v2320_v22 = vld [vmem:[%s2990_s4 + $0x38] sm:$0xff]   ;;  %vm302_vm4 = vcmask 523264   ;;  %s3014_s25 = sld [smem:[#allocation13_spill]]  ;;  %s3015_s27 = sld [smem:[#allocation14_spill]] }
   0x9   :  { %2129 = vmatprep.subr.bf16.mxu1 %v2437_v1  ;;  %362 = vst.msk [vmem:[#allocation3] sm:$0x1] %vm361_vm3, %v2437_v1  ;;  %363 = vst.msk [vmem:[#allocation3 + $0x10] sm:$0x1] %vm361_vm3, %v2437_v1  ;;  %vm356_vm5 = vcmask 1040384   ;;  %v2325_v19 = vld [vmem:[%s2990_s4 + $0x40] sm:$0xff]  }
   0xa   :  { %364 = vst.msk [vmem:[#allocation3 + $0x9] sm:$0x1] %vm361_vm3, %v2437_v1  ;;  %365 = vst.msk [vmem:[#allocation3 + $0x19] sm:$0x1] %vm361_vm3, %v2437_v1  ;;  %vm658_vm6 = vcmask 253952   ;;  %vm611_vm7 = vcmask 261120  }
   0xb   :  { %v2313_v0 = vld [vmem:[%s3012_s20 + $0x8] sm:$0xff]   ;;  %v2560_v2 = vld [vmem:[%s3013_s22] sm:$0xff]  ;;  %v2315_v11 = vld [vmem:[%s3012_s20 + $0x10] sm:$0xff]   ;;  %659 = vst.msk [vmem:[#allocation4] sm:$0x1] %vm658_vm6, %v2437_v1  ;;  %s2439_s21 = smov 16  }
   0xc   :  { %v2565_v3 = vld [vmem:[%s3013_s22 + $0x8] sm:$0xff]  ;;  %2104 = vmatpush3.bf16.msra.mxu0 %v2313_v0  ;;  %72 = vst.msk [vmem:[#allocation2 + $0x2] sm:$0xff] %vm71_vm2, %v2560_v2  ;;  %v2314_v6 = vld [vmem:[%s3012_s20] sm:$0xff]   ;;  %v2316_v15 = vld [vmem:[%s3012_s20 + $0x18] sm:$0xff]   ;;  %2130 = vmatpush3.bf16.msra.mxu1 %v2318_v20  ;;  %vm1422_vm8 = vcmask 385024  }
   0xd   :  { %2109 = vmatprep.subr.bf16.mxu0 %v2437_v1  ;;  %73 = vst.msk [vmem:[#allocation2 + $0x12] sm:$0xff] %vm71_vm2, %v2565_v3  ;;  %2131 = vmatprep.subr.bf16.mxu1 %v2437_v1 }
   0xe   :  { %v1994_v57 = vld [vmem:[%s3014_s25] ss:$0 sm:$0xff]  ;;  %660 = vst.msk [vmem:[#allocation4 + $0x10] sm:$0x1] %vm658_vm6, %v2437_v1  ;;  %661 = vst.msk [vmem:[#allocation4 + $0x9] sm:$0x1] %vm658_vm6, %v2437_v1 }
   0xf   :  { %v1995_v60 = vld [vmem:[%s3015_s27] ss:$0 sm:$0xff]  ;;  %662 = vst.msk [vmem:[#allocation4 + $0x19] sm:$0x1] %vm658_vm6, %v2437_v1 }
  0x10   :  { %2132 = vmatpush3.bf16.msra.mxu1 %v2319_v21  ;;  %v2326_v21 = vld [vmem:[%s2990_s4 + $0x48] sm:$0xff]  }
  0x11   :  { %2133 = vmatprep.subr.bf16.mxu1 %v2437_v1 }
  0x13   :  { %v79_v4 = vld [vmem:[#allocation2 + $0x1] sm:$0xff] }
  0x14   :  { %v80_v5 = vld [vmem:[#allocation2 + $0x11] sm:$0xff]  ;;  %v74_v8 = vld [vmem:[#allocation2] sm:$0xff]  ;;  %2134 = vmatpush3.bf16.msra.mxu1 %v2320_v22 }
  0x15   :  { %v83_v7 = vpack.c.bf16 %v80_v5, %v79_v4  ;;  %v75_v9 = vld [vmem:[#allocation2 + $0x10] sm:$0xff]  ;;  %v184_v12 = vld [vmem:[#allocation2 + $0x2] sm:$0xff]  ;;  %2139 = vmatprep.subr.bf16.mxu1 %v2437_v1 }
  0x16   :  { %v78_v10 = vpack.c.bf16 %v75_v9, %v74_v8  ;;  %v185_v13 = vld [vmem:[#allocation2 + $0x12] sm:$0xff]  ;;  %v241_v16 = vld [vmem:[#allocation2 + $0x3] sm:$0xff] }
  0x17   :  { %2106 = vmatmul.mubr.msk.bf16.vlgmr.msra.gmra.mrb[0].mxu0 %vm71_vm2, %v83_v7  ;;  %v188_v14 = vpack.c.bf16 %v185_v13, %v184_v12  ;;  %v242_v17 = vld [vmem:[#allocation2 + $0x13] sm:$0xff]  ;;  %v2321_v12 = vld [vmem:[%s2990_s4] sm:$0xff]  }
  0x18   :  { %2110 = vmatpush3.bf16.msra.mxu0 %v2314_v6  ;;  %2111 = vmatprep.mubr.msk.bf16.mxu0 %vm2438_vm1, %v2437_v1  ;;  %v245_v18 = vpack.c.bf16 %v242_v17, %v241_v16  ;;  %v2324_v16 = vld [vmem:[%s2990_s4 + $0x18] sm:$0xff]   ;;  %v2327_v22 = vld [vmem:[%s2990_s4 + $0x50] sm:$0xff]  }
  0x19   :  { %2115 = vmatprep.subr.bf16.mxu0 %v2437_v1 }
  0x23   :  { %2112 = vmatmul.mubr.msk.bf16.vlgmr.msra.gmra.mrb[0].mxu0 %vm71_vm2, %v78_v10 }
  0x24   :  { %2116 = vmatpush3.bf16.msra.mxu0 %v2315_v11  ;;  %2117 = vmatprep.mubr.msk.bf16.mxu0 %vm2438_vm1, %v2437_v1 }
  0x25   :  { %2121 = vmatprep.subr.bf16.mxu0 %v2437_v1 }
  0x2f   :  { %2118 = vmatmul.mubr.msk.bf16.vlgmr.msra.gmra.mrb[0].mxu0 %vm71_vm2, %v188_v14  ;;  %v2322_v14 = vld [vmem:[%s2990_s4 + $0x8] sm:$0xff]  }
  0x30   :  { %2122 = vmatpush3.bf16.msra.mxu0 %v2316_v15  ;;  %2123 = vmatprep.mubr.msk.bf16.mxu0 %vm2438_vm1, %v2437_v1  ;;  %v2323_v15 = vld [vmem:[%s2990_s4 + $0x10] sm:$0xff]  }
  0x31   :  { %2163 = vmatprep.subr.bf16.mxu0 %v2437_v1 }
  0x3b   :  { %2124 = vmatmul.mubr.msk.bf16.vlgmr.msra.gmra.mrb[0].mxu0 %vm71_vm2, %v245_v18 }
  0x3c   :  { %2167 = vmatprep.mubr.msk.bf16.mxu0 %vm2438_vm1, %v2437_v1 }
 0x10e   :  { %v289_v23 = vpop.f32.mrb[0].mxu0 }
 0x10f   :  { %v298_v24 = vmax.f32 %v289_v23, 0.0  ;;  %v2125_v25 = vpop.f32.mrb[1].mxu0  ;;  %v2328_v23 = vld [vmem:[%s2990_s4 + $0x58] sm:$0xff]  }
 0x110   :  { %v292_v26 = vpop.f32.mrb[2].mxu0 }
 0x111   :  { %v314_v27 = vmul.f32 %v298_v24, %v298_v24  ;;  %v299_v28 = vmax.f32 %v292_v26, 0.0  ;;  %v2126_v29 = vpop.f32.mrb[3].mxu0  ;;  %v303_v30 = vsel %vm302_vm4, %v298_v24, 0.0 }
 0x113   :  { %v304_v31 = vsel %vm302_vm4, %v299_v28, 0.0  ;;  %v315_v32 = vmul.f32 %v299_v28, %v299_v28  ;;  %v316_v34 = vsel %vm302_vm4, %v314_v27, 0.0  ;;  %v2329_v27 = vld [vmem:[%s2993_s7 + $0x10] sm:$0xff]  }
 0x114   :  { %v305_v33 = vadd.f32 %v304_v31, %v303_v30  ;;  %2164 = vmatpush3.bf16.msra.mxu0 %v2329_v27 }
 0x115   :  { %v317_v35 = vsel %vm302_vm4, %v315_v32, 0.0  ;;  %2165 = vmatprep.subr.bf16.mxu0 %v2437_v1 }
 0x116   :  { %v306_v36 = vrot.slane %v305_v33, 4  ;;  %v318_v37 = vadd.f32 %v317_v35, %v316_v34 }
 0x118   :  { %v307_v38 = vadd.f32 %v306_v36, %v305_v33  ;;  %v319_v39 = vrot.slane %v318_v37, 4 }
 0x11a   :  { %v308_v40 = vrot.slane %v307_v38, 2  ;;  %v320_v41 = vadd.f32 %v319_v39, %v318_v37 }
 0x11c   :  { %v309_v42 = vadd.f32 %v308_v40, %v307_v38  ;;  %v321_v43 = vrot.slane %v320_v41, 2 }
 0x11e   :  { %v310_v44 = vrot.slane %v309_v42, 1  ;;  %v322_v45 = vadd.f32 %v321_v43, %v320_v41 }
 0x120   :  { %v311_v46 = vadd.f32 %v310_v44, %v309_v42  ;;  %v323_v47 = vrot.slane %v322_v45, 1 }
 0x122   :  { %v313_v48 = vmul.f32 0.0625, %v311_v46  ;;  %v324_v49 = vadd.f32 %v323_v47, %v322_v45 }
 0x124   :  { %v325_v50 = vmul.f32 0.0625, %v324_v49  ;;  %v326_v51 = vmul.f32 %v313_v48, %v313_v48  ;;  %v328_v52 = vsub.f32 %v298_v24, %v313_v48  ;;  %v329_v53 = vsub.f32 %v299_v28, %v313_v48  ;;  %v2330_v28 = vld [vmem:[%s2993_s7 + $0x18] sm:$0xff]  }
 0x125   :  { %2166 = vmatpush3.bf16.msra.mxu0 %v2330_v28 }
 0x126   :  { %v327_v54 = vsub.f32 %v325_v50, %v326_v51  ;;  %2171 = vmatprep.subr.bf16.mxu0 %v2437_v1 }
 0x128   :  { %v330_v55 = vadd.f32 1e-05, %v327_v54 }
 0x12a   :  { %2339 = vrsqrt.f32 %v330_v55 }
 0x134   :  { %v2340_v56 = vpop.eup %2339 }
 0x135   :  { %v332_v58 = vmul.f32 %v2340_v56, %v328_v52  ;;  %v333_v59 = vmul.f32 %v2340_v56, %v329_v53 }
 0x137   :  { %v340_v61 = vmul.f32 %v1994_v57, %v332_v58  ;;  %v341_v62 = vmul.f32 %v1994_v57, %v333_v59 }
 0x139   :  { %v348_v63 = vadd.f32 %v1995_v60, %v340_v61  ;;  %v349_v0 = vadd.f32 %v1995_v60, %v341_v62 }
 0x13b   :  { %v352_v4 = vrot.slane %v348_v63, 7  ;;  %v353_v5 = vrot.slane %v349_v0, 7 }
 0x13d   :  { %v357_v6 = vsel %vm356_vm5, %v348_v63, %v352_v4  ;;  %v358_v7 = vsel %vm356_vm5, %v349_v0, %v353_v5  ;;  %v2012_v5 = vld [vmem:[%s2992_s6] ss:$0 sm:$0xff] }
 0x13e   :  { %v359_v8 = vmax.f32 %v348_v63, %v357_v6  ;;  %v360_v9 = vmax.f32 %v349_v0, %v358_v7  ;;  %v2011_v63 = vld [vmem:[%s2991_s5] ss:$0 sm:$0xff] }
 0x140   :  { %366 = vst.msk [vmem:[#allocation3 + $0x1] sm:$0xff] %vm302_vm4, %v359_v8  ;;  %367 = vst.msk [vmem:[#allocation3 + $0x11] sm:$0xff] %vm302_vm4, %v360_v9 }
 0x147   :  { %v379_v10 = vld [vmem:[#allocation3 + $0x1] sm:$0xff]  ;;  %v380_v11 = vld [vmem:[#allocation3 + $0x11] sm:$0xff] }
 0x148   :  { %v389_v13 = vpack.c.bf16 %v380_v11, %v379_v10  ;;  %v368_v17 = vld [vmem:[#allocation3] sm:$0xff]  ;;  %v369_v18 = vld [vmem:[#allocation3 + $0x10] sm:$0xff] }
 0x149   :  { %v378_v20 = vpack.c.bf16 %v369_v18, %v368_v17  ;;  %v526_v24 = vld [vmem:[#allocation3 + $0x2] sm:$0xff]  ;;  %v527_v25 = vld [vmem:[#allocation3 + $0x12] sm:$0xff] }
 0x14a   :  { %2136 = vmatmul.mubr.msk.bf16.vlgmr.msra.gmra.mrb[0].mxu1 %vm302_vm4, %v389_v13  ;;  %v536_v26 = vpack.c.bf16 %v527_v25, %v526_v24  ;;  %v2333_v17 = vld [vmem:[%s2993_s7 + $0x20] sm:$0xff]   ;;  %v2336_v24 = vld [vmem:[%s2996_s10 + $0x8] sm:$0xff]  }
 0x14b   :  { %2140 = vmatpush3.bf16.msra.mxu1 %v2321_v12  ;;  %2147 = vmatprep.mubr.msk.bf16.mxu1 %vm2438_vm1, %v2437_v1  ;;  %v2331_v12 = vld [vmem:[%s2993_s7] sm:$0xff]  }
 0x14c   :  { %2141 = vmatprep.subr.bf16.mxu1 %v2437_v1  ;;  %v2742_v25 = vld [vmem:[%s2997_s11] sm:$0xff]  }
 0x14f   :  { %2142 = vmatpush3.bf16.msra.mxu1 %v2322_v14  ;;  %v2332_v14 = vld [vmem:[%s2993_s7 + $0x8] sm:$0xff]  }
 0x150   :  { %2143 = vmatprep.subr.bf16.mxu1 %v2437_v1 }
 0x153   :  { %2144 = vmatpush3.bf16.msra.mxu1 %v2323_v15 }
 0x154   :  { %2145 = vmatprep.subr.bf16.mxu1 %v2437_v1 }
 0x157   :  { %2146 = vmatpush3.bf16.msra.mxu1 %v2324_v16 }
 0x158   :  { %2151 = vmatprep.subr.bf16.mxu1 %v2437_v1 }
 0x15a   :  { %2148 = vmatmul.mubr.msk.bf16.vlgmr.msra.gmra.mrb[0].mxu1 %vm302_vm4, %v378_v20 }
 0x15b   :  { %2152 = vmatpush3.bf16.msra.mxu1 %v2325_v19  ;;  %2159 = vmatprep.mubr.msk.bf16.mxu1 %vm2438_vm1, %v2437_v1  ;;  %v2334_v19 = vld [vmem:[%s2993_s7 + $0x28] sm:$0xff]  }
 0x15c   :  { %2153 = vmatprep.subr.bf16.mxu1 %v2437_v1 }
 0x15f   :  { %2154 = vmatpush3.bf16.msra.mxu1 %v2326_v21 }
 0x160   :  { %2155 = vmatprep.subr.bf16.mxu1 %v2437_v1 }
 0x163   :  { %2156 = vmatpush3.bf16.msra.mxu1 %v2327_v22 }
 0x164   :  { %2157 = vmatprep.subr.bf16.mxu1 %v2437_v1 }
 0x167   :  { %2158 = vmatpush3.bf16.msra.mxu1 %v2328_v23  ;;  %v2335_v23 = vld [vmem:[%s2996_s10] sm:$0xff]  }
 0x168   :  { %2187 = vmatprep.subr.bf16.mxu1 %v2437_v1 }
 0x16a   :  { %2160 = vmatmul.mubr.msk.bf16.vlgmr.msra.gmra.mrb[0].mxu1 %vm302_vm4, %v536_v26 }
 0x16b   :  { %2191 = vmatprep.mubr.msk.bf16.mxu1 %vm2438_vm1, %v2437_v1  ;;  %2188 = vmatpush3.bf16.msra.mxu1 %v2335_v23 }
 0x16c   :  { %2189 = vmatprep.subr.bf16.mxu1 %v2437_v1 }
 0x16f   :  { %2190 = vmatpush3.bf16.msra.mxu1 %v2336_v24 }
 0x170   :  { %2201 = vmatprep.subr.bf16.mxu1 %v2437_v1 }
 0x23d   :  { %v598_v29 = vpop.f32.mrb[0].mxu1 }
 0x23e   :  { %v607_v30 = vmax.f32 %v598_v29, 0.0  ;;  %v2161_v31 = vpop.f32.mrb[1].mxu1 }
 0x23f   :  { %v601_v32 = vpop.f32.mrb[2].mxu1 }
 0x240   :  { %v622_v33 = vmul.f32 %v607_v30, %v607_v30  ;;  %v608_v34 = vmax.f32 %v601_v32, 0.0  ;;  %v2162_v35 = vpop.f32.mrb[3].mxu1  ;;  %v612_v36 = vsel %vm611_vm7, %v607_v30, 0.0 }
 0x242   :  { %v613_v37 = vsel %vm611_vm7, %v608_v34, 0.0  ;;  %v623_v38 = vmul.f32 %v608_v34, %v608_v34  ;;  %v624_v40 = vsel %vm611_vm7, %v622_v33, 0.0 }
 0x243   :  { %v614_v39 = vadd.f32 %v613_v37, %v612_v36 }
 0x244   :  { %v625_v41 = vsel %vm611_vm7, %v623_v38, 0.0 }
 0x245   :  { %v615_v42 = vrot.slane %v614_v39, 4  ;;  %v626_v43 = vadd.f32 %v625_v41, %v624_v40 }
 0x247   :  { %v616_v44 = vadd.f32 %v615_v42, %v614_v39  ;;  %v627_v45 = vrot.slane %v626_v43, 4 }
 0x249   :  { %v617_v46 = vrot.slane %v616_v44, 2  ;;  %v628_v47 = vadd.f32 %v627_v45, %v626_v43 }
 0x24b   :  { %v618_v48 = vadd.f32 %v617_v46, %v616_v44  ;;  %v629_v49 = vrot.slane %v628_v47, 2 }
 0x24d   :  { %v619_v50 = vrot.slane %v618_v48, 1  ;;  %v630_v51 = vadd.f32 %v629_v49, %v628_v47 }
 0x24f   :  { %v620_v52 = vadd.f32 %v619_v50, %v618_v48  ;;  %v631_v53 = vrot.slane %v630_v51, 1 }
 0x251   :  { %v621_v54 = vmul.f32 0.0625, %v620_v52  ;;  %v632_v55 = vadd.f32 %v631_v53, %v630_v51 }
 0x253   :  { %v633_v56 = vmul.f32 0.0625, %v632_v55  ;;  %v634_v57 = vmul.f32 %v621_v54, %v621_v54  ;;  %v636_v58 = vsub.f32 %v607_v30, %v621_v54  ;;  %v637_v59 = vsub.f32 %v608_v34, %v621_v54 }
 0x255   :  { %v635_v60 = vsub.f32 %v633_v56, %v634_v57 }
 0x257   :  { %v638_v61 = vadd.f32 1e-05, %v635_v60 }
 0x259   :  { %2341 = vrsqrt.f32 %v638_v61  ;;  %v2023_v61 = vld [vmem:[%s2995_s9] ss:$0 sm:$0xff] }
 0x263   :  { %v2342_v62 = vpop.eup %2341 }
 0x264   :  { %v640_v0 = vmul.f32 %v2342_v62, %v636_v58  ;;  %v641_v4 = vmul.f32 %v2342_v62, %v637_v59  ;;  %v2022_v58 = vld [vmem:[%s2994_s8] ss:$0 sm:$0xff] }
 0x266   :  { %v648_v6 = vmul.f32 %v2011_v63, %v640_v0  ;;  %v649_v7 = vmul.f32 %v2011_v63, %v641_v4 }
 0x268   :  { %v656_v8 = vadd.f32 %v2012_v5, %v648_v6  ;;  %v657_v9 = vadd.f32 %v2012_v5, %v649_v7 }
 0x26a   :  { %663 = vst.msk [vmem:[#allocation4 + $0x1] sm:$0xff] %vm611_vm7, %v656_v8  ;;  %664 = vst.msk [vmem:[#allocation4 + $0x11] sm:$0xff] %vm611_vm7, %v657_v9 }
 0x271   :  { %v672_v10 = vld [vmem:[#allocation4 + $0x1] sm:$0xff]  ;;  %v673_v11 = vld [vmem:[#allocation4 + $0x11] sm:$0xff] }
 0x272   :  { %v678_v13 = vpack.c.bf16 %v673_v11, %v672_v10  ;;  %v665_v15 = vld [vmem:[#allocation4] sm:$0xff]  ;;  %v666_v16 = vld [vmem:[#allocation4 + $0x10] sm:$0xff] }
 0x273   :  { %v671_v18 = vpack.c.bf16 %v666_v16, %v665_v15  ;;  %v791_v20 = vld [vmem:[#allocation4 + $0x2] sm:$0xff]  ;;  %v792_v21 = vld [vmem:[#allocation4 + $0x12] sm:$0xff] }
 0x274   :  { %2168 = vmatmul.mubr.msk.bf16.vlgmr.msra.gmra.mrb[4].mxu0 %vm611_vm7, %v678_v13  ;;  %v797_v22 = vpack.c.bf16 %v792_v21, %v791_v20  ;;  %v2771_v13 = vld [vmem:[%s2998_s12] ss:$0 sm:$0xff]  ;;  %s2440_s12 = smov 112  }
 0x275   :  { %2172 = vmatpush3.bf16.msra.mxu0 %v2331_v12  ;;  %2175 = vmatprep.mubr.msk.bf16.mxu0 %vm2438_vm1, %v2437_v1 }
 0x276   :  { %2173 = vmatprep.subr.bf16.mxu0 %v2437_v1 }
 0x279   :  { %2174 = vmatpush3.bf16.msra.mxu0 %v2332_v14 }
 0x27a   :  { %2179 = vmatprep.subr.bf16.mxu0 %v2437_v1 }
 0x280   :  { %2176 = vmatmul.mubr.msk.bf16.vlgmr.msra.gmra.mrb[4].mxu0 %vm611_vm7, %v671_v18 }
 0x281   :  { %2180 = vmatpush3.bf16.msra.mxu0 %v2333_v17  ;;  %2183 = vmatprep.mubr.msk.bf16.mxu0 %vm2438_vm1, %v2437_v1 }
 0x282   :  { %2181 = vmatprep.subr.bf16.mxu0 %v2437_v1 }
 0x285   :  { %2182 = vmatpush3.bf16.msra.mxu0 %v2334_v19 }
 0x286   :  { %2195 = vmatprep.subr.bf16.mxu0 %v2437_v1 }
 0x28c   :  { %2184 = vmatmul.mubr.msk.bf16.vlgmr.msra.gmra.mrb[4].mxu0 %vm611_vm7, %v797_v22 }
 0x28d   :  { %2197 = vmatprep.mubr.msk.bf16.mxu0 %vm2438_vm1, %v2437_v1  ;;  %2196 = vmatpush3.bf16.msra.mxu0 %v2742_v25 }
 0x28e   :  { %2207 = vmatprep.subr.bf16.mxu0 %v2437_v1 }
 0x35f   :  { %v847_v26 = vpop.f32.mrb[4].mxu0 }
 0x360   :  { %v868_v27 = vmul.f32 %v847_v26, %v847_v26  ;;  %v2185_v28 = vpop.f32.mrb[5].mxu0  ;;  %v858_v30 = vsel %vm611_vm7, %v847_v26, 0.0 }
 0x361   :  { %v850_v29 = vpop.f32.mrb[6].mxu0 }
 0x362   :  { %v859_v31 = vsel %vm611_vm7, %v850_v29, 0.0  ;;  %v869_v32 = vmul.f32 %v850_v29, %v850_v29  ;;  %v2186_v33 = vpop.f32.mrb[7].mxu0  ;;  %v870_v35 = vsel %vm611_vm7, %v868_v27, 0.0 }
 0x363   :  { %v860_v34 = vadd.f32 %v859_v31, %v858_v30 }
 0x364   :  { %v871_v36 = vsel %vm611_vm7, %v869_v32, 0.0 }
 0x365   :  { %v861_v37 = vrot.slane %v860_v34, 4  ;;  %v872_v38 = vadd.f32 %v871_v36, %v870_v35 }
 0x367   :  { %v862_v39 = vadd.f32 %v861_v37, %v860_v34  ;;  %v873_v40 = vrot.slane %v872_v38, 4 }
 0x369   :  { %v863_v41 = vrot.slane %v862_v39, 2  ;;  %v874_v42 = vadd.f32 %v873_v40, %v872_v38 }
 0x36b   :  { %v864_v43 = vadd.f32 %v863_v41, %v862_v39  ;;  %v875_v44 = vrot.slane %v874_v42, 2 }
 0x36d   :  { %v865_v45 = vrot.slane %v864_v43, 1  ;;  %v876_v46 = vadd.f32 %v875_v44, %v874_v42 }
 0x36f   :  { %v866_v47 = vadd.f32 %v865_v45, %v864_v43  ;;  %v877_v48 = vrot.slane %v876_v46, 1 }
 0x371   :  { %v867_v49 = vmul.f32 0.0625, %v866_v47  ;;  %v878_v50 = vadd.f32 %v877_v48, %v876_v46 }
 0x373   :  { %v879_v51 = vmul.f32 0.0625, %v878_v50  ;;  %v880_v52 = vmul.f32 %v867_v49, %v867_v49  ;;  %v882_v53 = vsub.f32 %v847_v26, %v867_v49  ;;  %v883_v54 = vsub.f32 %v850_v29, %v867_v49 }
 0x375   :  { %v881_v55 = vsub.f32 %v879_v51, %v880_v52 }
 0x377   :  { %v884_v56 = vadd.f32 1e-05, %v881_v55 }
 0x379   :  { %2343 = vrsqrt.f32 %v884_v56 }
 0x383   :  { %v2344_v57 = vpop.eup %2343 }
 0x384   :  { %v886_v59 = vmul.f32 %v2344_v57, %v882_v53  ;;  %v887_v60 = vmul.f32 %v2344_v57, %v883_v54 }
 0x386   :  { %v894_v62 = vmul.f32 %v2022_v58, %v886_v59  ;;  %v895_v63 = vmul.f32 %v2022_v58, %v887_v60 }
 0x388   :  { %v902_v0 = vadd.f32 %v2023_v61, %v894_v62  ;;  %v903_v4 = vadd.f32 %v2023_v61, %v895_v63 }
 0x38a   :  { %v908_v5 = vpack.c.bf16 %v903_v4, %v902_v0 }
 0x38c   :  { %2192 = vmatmul.mubr.msk.bf16.vlgmr.msra.gmra.mrb[4].mxu1 %vm611_vm7, %v908_v5 }
 0x38d   :  { %2202 = vmatpush3.bf16.msra.mxu1 %v2742_v25  ;;  %2203 = vmatprep.mubr.msk.bf16.mxu1 %vm2438_vm1, %v2437_v1 }
 0x38e   :  { %2213 = vmatprep.subr.bf16.mxu1 %v2437_v1 }
 0x45f   :  { %v958_v6 = vpop.f32.mrb[4].mxu1 }
 0x460   :  { %v2193_v7 = vpop.f32.mrb[5].mxu1  ;;  %v959_v9 = vadd.f32 %v958_v6, %v2560_v2 }
 0x461   :  { %v961_v8 = vpop.f32.mrb[6].mxu1 }
 0x462   :  { %v962_v10 = vadd.f32 %v961_v8, %v2565_v3  ;;  %v2194_v11 = vpop.f32.mrb[7].mxu1 }
 0x464   :  { %v974_v12 = vpack.c.bf16 %v962_v10, %v959_v9 }
 0x466   :  { %2198 = vmatmul.mubr.msk.bf16.vlgmr.msra.gmra.mrb[8].mxu0 %vm71_vm2, %v974_v12 }
 0x467   :  { %2208 = vmatpush3.bf16.msra.mxu0 %v2742_v25  ;;  %2209 = vmatprep.mubr.msk.bf16.mxu0 %vm2438_vm1, %v2437_v1 }
 0x468   :  { %2219 = vmatprep.subr.bf16.mxu0 %v2437_v1 }
 0x539   :  { %v1018_v14 = vpop.f32.mrb[8].mxu0 }
 0x53a   :  { %v1019_v2 = vadd.f32 %v2771_v13, %v1018_v14  ;;  %v2199_v3 = vpop.f32.mrb[9].mxu0 }
 0x53b   :  { %v1021_v15 = vpop.f32.mrb[10].mxu0 }
 0x53c   :  { %v1025_v16 = vmax.f32 %v1019_v2, 0.0  ;;  %v1022_v17 = vadd.f32 %v2771_v13, %v1021_v15  ;;  %v2200_v18 = vpop.f32.mrb[11].mxu0  ;;  %v2030_v22 = vmul.f32 -1.442695, %v1019_v2 }
 0x53e   :  { %v1026_v19 = vmax.f32 %v1022_v17, 0.0  ;;  %v1039_v20 = vsub.f32 %v1025_v16, %v959_v9  ;;  %2345 = vpow2.f32 %v2030_v22  ;;  %v2031_v23 = vmul.f32 -1.442695, %v1022_v17 }
 0x540   :  { %1043 = vrot.lane.b32.xlu0 %v1039_v20, %s2439_s21  ;;  %v1040_v21 = vsub.f32 %v1026_v19, %v962_v10  ;;  %2347 = vpow2.f32 %v2031_v23 }
 0x544   :  { %1045 = vrot.lane.b32.xlu0 %v1040_v21, %s2439_s21 }
 0x548   :  { %v2346_v24 = vpop.eup %2345 }
 0x549   :  { %v1033_v26 = vadd.f32 1.0, %v2346_v24 }
 0x54a   :  { %v2348_v27 = vpop.eup %2347 }
 0x54b   :  { %2349 = vrcp.f32 %v1033_v26  ;;  %v1034_v28 = vadd.f32 1.0, %v2348_v27 }
 0x54d   :  { %2351 = vrcp.f32 %v1034_v28 }
 0x555   :  { %v2350_v29 = vpop.eup %2349 }
 0x557   :  { %v2352_v32 = vpop.eup %2351 }
 0x5b2   :  { %v1044_v30 = vpop.permute.xlu0 %1043 }
 0x5b3   :  { %v1049_v31 = vmul.f32 %v2350_v29, %v1044_v30 }
 0x5b5   :  { %1053 = vrot.lane.b32.xlu1 %v1049_v31, %s2440_s12  ;;  %v2338_v31 = vld [vmem:[%s2999_s13] sm:$0xff]  }
 0x5b6   :  { %v1046_v33 = vpop.permute.xlu0 %1045 }
 0x5b7   :  { %v1050_v34 = vmul.f32 %v2352_v32, %v1046_v33 }
 0x5b9   :  { %1055 = vrot.lane.b32.xlu1 %v1050_v34, %s2440_s12 }
 0x627   :  { %v1054_v35 = vpop.permute.xlu1 %1053 }
 0x628   :  { %v1059_v37 = vadd.f32 %v1054_v35, %v959_v9 }
 0x62b   :  { %v1056_v36 = vpop.permute.xlu1 %1055 }
 0x62c   :  { %v1060_v38 = vadd.f32 %v1056_v36, %v962_v10 }
 0x62e   :  { %v1061_v39 = vpack.c.bf16 %v1060_v38, %v1059_v37 }
 0x630   :  { %2204 = vmatmul.mubr.msk.bf16.vlgmr.msra.gmra.mrb[8].mxu1 %vm71_vm2, %v1061_v39 }
 0x631   :  { %2214 = vmatpush3.bf16.msra.mxu1 %v2742_v25  ;;  %2215 = vmatprep.mubr.msk.bf16.mxu1 %vm2438_vm1, %v2437_v1 }
 0x703   :  { %v1099_v40 = vpop.f32.mrb[8].mxu1 }
 0x704   :  { %v1100_v41 = vadd.f32 %v2771_v13, %v1099_v40  ;;  %v2205_v42 = vpop.f32.mrb[9].mxu1 }
 0x705   :  { %v1102_v43 = vpop.f32.mrb[10].mxu1 }
 0x706   :  { %v1106_v44 = vmax.f32 %v1100_v41, 0.0  ;;  %v1103_v45 = vadd.f32 %v2771_v13, %v1102_v43  ;;  %v2206_v46 = vpop.f32.mrb[11].mxu1  ;;  %v2033_v25 = vmul.f32 -1.442695, %v1100_v41 }
 0x708   :  { %v1107_v47 = vmax.f32 %v1103_v45, 0.0  ;;  %v1120_v48 = vsub.f32 %v1106_v44, %v1059_v37  ;;  %v2034_v50 = vmul.f32 -1.442695, %v1103_v45  ;;  %2353 = vpow2.f32 %v2033_v25 }
 0x70a   :  { %1124 = vrot.lane.b32.xlu0 %v1120_v48, %s2439_s21  ;;  %v1121_v49 = vsub.f32 %v1107_v47, %v1060_v38  ;;  %2355 = vpow2.f32 %v2034_v50 }
 0x70c   :  { %1126 = vrot.lane.b32.xlu1 %v1121_v49, %s2439_s21 }
 0x712   :  { %v2354_v51 = vpop.eup %2353 }
 0x713   :  { %v1114_v53 = vadd.f32 1.0, %v2354_v51 }
 0x714   :  { %v2356_v52 = vpop.eup %2355 }
 0x715   :  { %v1115_v54 = vadd.f32 1.0, %v2356_v52  ;;  %2357 = vrcp.f32 %v1114_v53 }
 0x717   :  { %2359 = vrcp.f32 %v1115_v54 }
 0x71f   :  { %v2358_v55 = vpop.eup %2357 }
 0x721   :  { %v2360_v58 = vpop.eup %2359 }
 0x77c   :  { %v1125_v56 = vpop.permute.xlu0 %1124 }
 0x77d   :  { %v1130_v57 = vmul.f32 %v2358_v55, %v1125_v56 }
 0x77e   :  { %v1127_v59 = vpop.permute.xlu1 %1126 }
 0x77f   :  { %v1131_v60 = vmul.f32 %v2360_v58, %v1127_v59  ;;  %1134 = vrot.lane.b32.xlu0 %v1130_v57, %s2440_s12  ;;  %v2441_v57 = vmov 1966171168   ;;  %v1369_v59 = vlaneseq }
 0x780   :  { %v1367_v58 = vunpack.c.l.s4 %v2441_v57 }
 0x781   :  { %1136 = vrot.lane.b32.xlu1 %v1131_v60, %s2440_s12 }
 0x782   :  { %v1368_v60 = vunpack.c.0.s8 %v1367_v58 }
 0x7f1   :  { %v1135_v61 = vpop.permute.xlu0 %1134 }
 0x7f2   :  { %v1140_v63 = vadd.f32 %v1135_v61, %v1059_v37  ;;  %v1370_v61 = vshrl.u32 %v1369_v59, 7 }
 0x7f3   :  { %v1137_v62 = vpop.permute.xlu1 %1136 }
 0x7f4   :  { %v1141_v0 = vadd.f32 %v1137_v62, %v1060_v38  ;;  %v2041_v62 = vld [vmem:[%s3000_s14] ss:$0 sm:$0xff]  ;;  %s2442_s14 = smov 80  }
 0x7f6   :  { %v1142_v4 = vpack.c.bf16 %v1141_v0, %v1140_v63 }
 0x7f8   :  { %2210 = vmatmul.mubr.msk.bf16.vlgmr.msra.gmra.mrb[12].mxu0 %vm71_vm2, %v1142_v4 }
 0x7f9   :  { %2221 = vmatprep.mubr.msk.bf16.mxu0 %vm2438_vm1, %v2437_v1  ;;  %2220 = vmatpush3.bf16.msra.mxu0 %v2338_v31 }
 0x8cb   :  { %v1180_v5 = vpop.f32.mrb[12].mxu0 }
 0x8cc   :  { %v1181_v6 = vadd.f32 %v2771_v13, %v1180_v5  ;;  %v2211_v7 = vpop.f32.mrb[13].mxu0 }
 0x8cd   :  { %v1183_v8 = vpop.f32.mrb[14].mxu0 }
 0x8ce   :  { %v1187_v9 = vmax.f32 %v1181_v6, 0.0  ;;  %v1184_v10 = vadd.f32 %v2771_v13, %v1183_v8  ;;  %v2212_v11 = vpop.f32.mrb[15].mxu0  ;;  %v2036_v3 = vmul.f32 -1.442695, %v1181_v6 }
 0x8cf   :  { %v2812_v11 = vsub.s32 0, %v1370_v61 }
 0x8d0   :  { %v1188_v12 = vmax.f32 %v1184_v10, 0.0  ;;  %v1201_v14 = vsub.f32 %v1187_v9, %v1140_v63  ;;  %v2037_v15 = vmul.f32 -1.442695, %v1184_v10  ;;  %2361 = vpow2.f32 %v2036_v3 }
 0x8d2   :  { %1205 = vrot.lane.b32.xlu0 %v1201_v14, %s2439_s21  ;;  %v1202_v2 = vsub.f32 %v1188_v12, %v1141_v0  ;;  %2363 = vpow2.f32 %v2037_v15 }
 0x8d4   :  { %1207 = vrot.lane.b32.xlu1 %v1202_v2, %s2439_s21 }
 0x8da   :  { %v2362_v1 = vpop.eup %2361 }
 0x8db   :  { %v1195_v17 = vadd.f32 1.0, %v2362_v1 }
 0x8dc   :  { %v2364_v16 = vpop.eup %2363 }
 0x8dd   :  { %v1196_v18 = vadd.f32 1.0, %v2364_v16  ;;  %2365 = vrcp.f32 %v1195_v17 }
 0x8df   :  { %2367 = vrcp.f32 %v1196_v18 }
 0x8e7   :  { %v2366_v19 = vpop.eup %2365 }
 0x8e9   :  { %v2368_v22 = vpop.eup %2367 }
 0x944   :  { %v1206_v20 = vpop.permute.xlu0 %1205 }
 0x945   :  { %v1211_v21 = vmul.f32 %v2366_v19, %v1206_v20 }
 0x946   :  { %v1208_v23 = vpop.permute.xlu1 %1207 }
 0x947   :  { %v1212_v24 = vmul.f32 %v2368_v22, %v1208_v23  ;;  %1215 = vrot.lane.b32.xlu0 %v1211_v21, %s2440_s12 }
 0x949   :  { %1217 = vrot.lane.b32.xlu1 %v1212_v24, %s2440_s12 }
 0x9b9   :  { %v1216_v26 = vpop.permute.xlu0 %1215 }
 0x9ba   :  { %v1221_v28 = vadd.f32 %v1216_v26, %v1140_v63  ;;  %v1371_v63 = vsub.s32 %v1368_v60, %v1370_v61 }
 0x9bb   :  { %v1218_v27 = vpop.permute.xlu1 %1217 }
 0x9bc   :  { %v1222_v29 = vadd.f32 %v1218_v27, %v1141_v0 }
 0x9be   :  { %v1223_v30 = vpack.c.bf16 %v1222_v29, %v1221_v28 }
 0x9c0   :  { %2216 = vmatmul.mubr.msk.bf16.vlgmr.msra.gmra.mrb[12].mxu1 %vm71_vm2, %v1223_v30 }
 0xa93   :  { %v1261_v32 = vpop.f32.mrb[12].mxu1 }
 0xa94   :  { %v1262_v33 = vadd.f32 %v2771_v13, %v1261_v32  ;;  %v2217_v34 = vpop.f32.mrb[13].mxu1 }
 0xa95   :  { %v1264_v35 = vpop.f32.mrb[14].mxu1 }
 0xa96   :  { %v1268_v36 = vmax.f32 %v1262_v33, 0.0  ;;  %v1265_v37 = vadd.f32 %v2771_v13, %v1264_v35  ;;  %v2218_v38 = vpop.f32.mrb[15].mxu1  ;;  %v2039_v42 = vmul.f32 -1.442695, %v1262_v33 }
 0xa98   :  { %v1269_v39 = vmax.f32 %v1265_v37, 0.0  ;;  %v1282_v40 = vsub.f32 %v1268_v36, %v1221_v28  ;;  %v2040_v43 = vmul.f32 -1.442695, %v1265_v37  ;;  %2369 = vpow2.f32 %v2039_v42 }
 0xa9a   :  { %1286 = vrot.lane.b32.xlu0 %v1282_v40, %s2439_s21  ;;  %v1283_v41 = vsub.f32 %v1269_v39, %v1222_v29  ;;  %2371 = vpow2.f32 %v2040_v43 }
 0xa9c   :  { %1288 = vrot.lane.b32.xlu1 %v1283_v41, %s2439_s21 }
 0xaa2   :  { %v2370_v44 = vpop.eup %2369 }
 0xaa3   :  { %v1276_v46 = vadd.f32 1.0, %v2370_v44 }
 0xaa4   :  { %v2372_v45 = vpop.eup %2371 }
 0xaa5   :  { %v1277_v47 = vadd.f32 1.0, %v2372_v45  ;;  %2373 = vrcp.f32 %v1276_v46  ;;  %v2852_v45 = vld [vmem:[%s3001_s15] sm:$0xff]  ;;  %v2857_v46 = vld [vmem:[%s3001_s15 + $0x8] sm:$0xff] }
 0xaa7   :  { %2375 = vrcp.f32 %v1277_v47  ;;  %v2862_v47 = vld [vmem:[%s3002_s16] sm:$0xff] }
 0xaaf   :  { %v2374_v48 = vpop.eup %2373 }
 0xab1   :  { %v2376_v25 = vpop.eup %2375 }
 0xb0c   :  { %v1287_v13 = vpop.permute.xlu0 %1286 }
 0xb0d   :  { %v1292_v49 = vmul.f32 %v2374_v48, %v1287_v13  ;;  %v2868_v48 = vld [vmem:[%s3002_s16 + $0x8] sm:$0xff]  ;;  %v2873_v13 = vld [vmem:[%s3003_s17] ss:$0 sm:$0xff]  ;;  %s2912_s16 = smov 0  }
 0xb0e   :  { %v1289_v50 = vpop.permute.xlu1 %1288 }
 0xb0f   :  { %v1293_v51 = vmul.f32 %v2376_v25, %v1289_v50  ;;  %1296 = vrot.lane.b32.xlu0 %v1292_v49, %s2440_s12  ;;  %v2878_v49 = vld [vmem:[%s3004_s18] ss:$0 sm:$0xff] }
 0xb11   :  { %1298 = vrot.lane.b32.xlu1 %v1293_v51, %s2440_s12 }
 0xb81   :  { %v1297_v52 = vpop.permute.xlu0 %1296 }
 0xb82   :  { %v1302_v54 = vadd.f32 %v1297_v52, %v1221_v28 }
 0xb83   :  { %v1299_v53 = vpop.permute.xlu1 %1298 }
 0xb84   :  { %v1303_v55 = vadd.f32 %v1299_v53, %v1222_v29 }
 0xb86   :  { %v1306_v56 = vpack.c.bf16 %v1303_v55, %v1302_v54 }
 0xb88   :  { %2222 = vmatmul.mubr.msk.bf16.vlgmr.msra.gmra.mrb[16].mxu0 %vm71_vm2, %v1306_v56 }
 0xc5b   :  { %v1357_v0 = vpop.f32.mrb[16].mxu0 }
 0xc5c   :  { %v1358_v4 = vadd.f32 %v2041_v62, %v1357_v0  ;;  %v2223_v5 = vpop.f32.mrb[17].mxu0 }
 0xc5d   :  { %v1360_v6 = vpop.f32.mrb[18].mxu0 }
 0xc5e   :  { %v1365_v7 = vcombine.high %v1358_v4, %v1358_v4  ;;  %v1372_v8 = vrot.slane %v1358_v4, %v1371_v63  ;;  %v1361_v9 = vadd.f32 %v2041_v62, %v1360_v6  ;;  %v2224_v10 = vpop.f32.mrb[19].mxu0 }
 0xc5f   :  { %v2908_v10 = vmov 0.0  }
 0xc60   :  { %v1379_v12 = vrot.slane %v1365_v7, %v1371_v63  ;;  %v1380_v14 = vcombine.high %v1372_v8, %v1372_v8  ;;  %v1388_v2 = vrot.slane %v1372_v8, %v1371_v63  ;;  %v1496_v3 = vcombine.high %v1361_v9, %v1361_v9 }
 0xc61   :  { %v1503_v15 = vrot.slane %v1361_v9, %v1371_v63 }
 0xc62   :  { %v1381_v1 = vcombine.high %v1379_v12, %v1379_v12  ;;  %v1395_v16 = vrot.slane %v1379_v12, %v1371_v63  ;;  %v1402_v17 = vrot.slane %v1380_v14, %v1371_v63  ;;  %1423 = vst.msk [vmem:[#allocation5] sm:$0x1] %vm1422_vm8, %v1388_v2  ;;  %v1510_v18 = vrot.slane %v1496_v3, %v1371_v63 }
 0xc63   :  { %v1511_v19 = vcombine.high %v1503_v15, %v1503_v15  ;;  %v1519_v20 = vrot.slane %v1503_v15, %v1371_v63  ;;  %v1434_v21 = vrot.slane %v1388_v2, %v2812_v11  ;;  %v1410_v22 = vcombine.high %v1388_v2, %v1388_v2 }
 0xc64   :  { %1424 = vst.msk [vmem:[#allocation5 + $0x2] sm:$0x1] %vm1422_vm8, %v1402_v17  ;;  %1427 = vst.msk [vmem:[#allocation5 + $0x8] sm:$0x1] %vm1422_vm8, %v1395_v16  ;;  %v1512_v23 = vcombine.high %v1510_v18, %v1510_v18  ;;  %v1526_v24 = vrot.slane %v1510_v18, %v1371_v63  ;;  %v1438_v26 = vrot.slane %v1402_v17, %v2812_v11 }
 0xc65   :  { %v1412_v27 = vcombine.high %v1402_v17, %v1402_v17  ;;  %v1533_v28 = vrot.slane %v1511_v19, %v1371_v63  ;;  %1553 = vst.msk [vmem:[#allocation5 + $0x1] sm:$0x1] %vm1422_vm8, %v1519_v20  ;;  %1463 = vrot.lane.b32.xlu0 %v1434_v21, %s2442_s14  ;;  %1425 = vst.msk [vmem:[#allocation5 + $0x4] sm:$0x1] %vm1422_vm8, %v1410_v22  ;;  %v1409_v29 = vrot.slane %v1381_v1, %v1371_v63 }
 0xc66   :  { %1557 = vst.msk [vmem:[#allocation5 + $0x9] sm:$0x1] %vm1422_vm8, %v1526_v24  ;;  %1465 = vrot.lane.b32.xlu1 %v1438_v26, %s2442_s14  ;;  %v1411_v30 = vcombine.high %v1395_v16, %v1395_v16  ;;  %v1541_v31 = vcombine.high %v1519_v20, %v1519_v20  ;;  %v1442_v32 = vrot.slane %v1410_v22, %v2812_v11 }
 0xc67   :  { %1426 = vst.msk [vmem:[#allocation5 + $0x6] sm:$0x1] %vm1422_vm8, %v1412_v27  ;;  %1554 = vst.msk [vmem:[#allocation5 + $0x3] sm:$0x1] %vm1422_vm8, %v1533_v28  ;;  %v1413_v33 = vcombine.high %v1409_v29, %v1409_v29  ;;  %v1543_v34 = vcombine.high %v1533_v28, %v1533_v28  ;;  %v1446_v35 = vrot.slane %v1412_v27, %v2812_v11 }
 0xc68   :  { %1428 = vst.msk [vmem:[#allocation5 + $0xa] sm:$0x1] %vm1422_vm8, %v1409_v29  ;;  %1429 = vst.msk [vmem:[#allocation5 + $0xc] sm:$0x1] %vm1422_vm8, %v1411_v30  ;;  %v1540_v36 = vrot.slane %v1512_v23, %v1371_v63  ;;  %v1542_v37 = vcombine.high %v1526_v24, %v1526_v24  ;;  %v1450_v39 = vrot.slane %v1395_v16, %v2812_v11 }
 0xc69   :  { %1555 = vst.msk [vmem:[#allocation5 + $0x5] sm:$0x1] %vm1422_vm8, %v1541_v31  ;;  %1467 = vrot.lane.b32.xlu0 %v1442_v32, %s2442_s14  ;;  %1430 = vst.msk [vmem:[#allocation5 + $0xe] sm:$0x1] %vm1422_vm8, %v1413_v33  ;;  %v1454_v40 = vrot.slane %v1409_v29, %v2812_v11  ;;  %v1564_v41 = vrot.slane %v1519_v20, %v2812_v11  ;;  %v1568_v42 = vrot.slane %v1533_v28, %v2812_v11 }
 0xc6a   :  { %1556 = vst.msk [vmem:[#allocation5 + $0x7] sm:$0x1] %vm1422_vm8, %v1543_v34  ;;  %1469 = vrot.lane.b32.xlu1 %v1446_v35, %s2442_s14  ;;  %1558 = vst.msk [vmem:[#allocation5 + $0xb] sm:$0x1] %vm1422_vm8, %v1540_v36  ;;  %v1544_v38 = vcombine.high %v1540_v36, %v1540_v36  ;;  %v1458_v43 = vrot.slane %v1411_v30, %v2812_v11  ;;  %v1462_v44 = vrot.slane %v1413_v33, %v2812_v11 }
 0xc6b   :  { %1559 = vst.msk [vmem:[#allocation5 + $0xd] sm:$0x1] %vm1422_vm8, %v1542_v37  ;;  %v1572_v25 = vrot.slane %v1541_v31, %v2812_v11  ;;  %v1576_v50 = vrot.slane %v1543_v34, %v2812_v11  ;;  %v1580_v51 = vrot.slane %v1526_v24, %v2812_v11  ;;  %v1584_v52 = vrot.slane %v1540_v36, %v2812_v11 }
 0xc6c   :  { %1560 = vst.msk [vmem:[#allocation5 + $0xf] sm:$0x1] %vm1422_vm8, %v1544_v38  ;;  %v1588_v53 = vrot.slane %v1542_v37, %v2812_v11  ;;  %v1592_v54 = vrot.slane %v1544_v38, %v2812_v11  ;;  %v2910_v11 = vmov 0.0  }
 0xc6d   :  { %1471 = vrot.lane.b32.xlu0 %v1450_v39, %s2442_s14 }
 0xc6e   :  { %1473 = vrot.lane.b32.xlu1 %v1454_v40, %s2442_s14 }
 0xc71   :  { %1593 = vrot.lane.b32.xlu0 %v1564_v41, %s2442_s14 }
 0xc72   :  { %1595 = vrot.lane.b32.xlu1 %v1568_v42, %s2442_s14 }
 0xc75   :  { %1475 = vrot.lane.b32.xlu0 %v1458_v43, %s2442_s14 }
 0xc76   :  { %1477 = vrot.lane.b32.xlu1 %v1462_v44, %s2442_s14 }
 0xc79   :  { %1597 = vrot.lane.b32.xlu0 %v1572_v25, %s2442_s14 }
 0xc7a   :  { %1599 = vrot.lane.b32.xlu1 %v1576_v50, %s2442_s14 }
 0xc7d   :  { %1601 = vrot.lane.b32.xlu0 %v1580_v51, %s2442_s14 }
 0xc7e   :  { %1603 = vrot.lane.b32.xlu1 %v1584_v52, %s2442_s14 }
 0xc81   :  { %1605 = vrot.lane.b32.xlu0 %v1588_v53, %s2442_s14 }
 0xc82   :  { %1607 = vrot.lane.b32.xlu1 %v1592_v54, %s2442_s14 }
 0xcd7   :  { %v1464_v55 = vpop.permute.xlu0 %1463 }
 0xcd8   :  { %1487 = vst.msk [vmem:[#allocation6] sm:$0x1] %vm1422_vm8, %v1464_v55  ;;  %v1466_v56 = vpop.permute.xlu1 %1465 }
 0xcd9   :  { %1488 = vst.msk [vmem:[#allocation6 + $0x2] sm:$0x1] %vm1422_vm8, %v1466_v56 }
 0xcdb   :  { %v1468_v57 = vpop.permute.xlu0 %1467 }
 0xcdc   :  { %1489 = vst.msk [vmem:[#allocation6 + $0x4] sm:$0x1] %vm1422_vm8, %v1468_v57  ;;  %v1470_v58 = vpop.permute.xlu1 %1469 }
 0xcdd   :  { %1490 = vst.msk [vmem:[#allocation6 + $0x6] sm:$0x1] %vm1422_vm8, %v1470_v58 }
 0xcdf   :  { %v1472_v59 = vpop.permute.xlu0 %1471 }
 0xce0   :  { %1491 = vst.msk [vmem:[#allocation6 + $0x8] sm:$0x1] %vm1422_vm8, %v1472_v59  ;;  %v1474_v60 = vpop.permute.xlu1 %1473 }
 0xce1   :  { %1492 = vst.msk [vmem:[#allocation6 + $0xa] sm:$0x1] %vm1422_vm8, %v1474_v60 }
 0xce3   :  { %v1594_v61 = vpop.permute.xlu0 %1593 }
 0xce4   :  { %1617 = vst.msk [vmem:[#allocation6 + $0x1] sm:$0x1] %vm1422_vm8, %v1594_v61  ;;  %v1596_v62 = vpop.permute.xlu1 %1595 }
 0xce5   :  { %1618 = vst.msk [vmem:[#allocation6 + $0x3] sm:$0x1] %vm1422_vm8, %v1596_v62 }
 0xce7   :  { %v1476_v63 = vpop.permute.xlu0 %1475 }
 0xce8   :  { %1493 = vst.msk [vmem:[#allocation6 + $0xc] sm:$0x1] %vm1422_vm8, %v1476_v63  ;;  %v1478_v0 = vpop.permute.xlu1 %1477 }
 0xce9   :  { %1494 = vst.msk [vmem:[#allocation6 + $0xe] sm:$0x1] %vm1422_vm8, %v1478_v0 }
 0xceb   :  { %v1598_v4 = vpop.permute.xlu0 %1597 }
 0xcec   :  { %1619 = vst.msk [vmem:[#allocation6 + $0x5] sm:$0x1] %vm1422_vm8, %v1598_v4  ;;  %v1600_v5 = vpop.permute.xlu1 %1599 }
 0xced   :  { %1620 = vst.msk [vmem:[#allocation6 + $0x7] sm:$0x1] %vm1422_vm8, %v1600_v5 }
 0xcef   :  { %v1602_v6 = vpop.permute.xlu0 %1601 }
 0xcf0   :  { %1621 = vst.msk [vmem:[#allocation6 + $0x9] sm:$0x1] %vm1422_vm8, %v1602_v6  ;;  %v1604_v7 = vpop.permute.xlu1 %1603 }
 0xcf1   :  { %1622 = vst.msk [vmem:[#allocation6 + $0xb] sm:$0x1] %vm1422_vm8, %v1604_v7 }
 0xcf3   :  { %v1606_v8 = vpop.permute.xlu0 %1605 }
 0xcf4   :  { %1623 = vst.msk [vmem:[#allocation6 + $0xd] sm:$0x1] %vm1422_vm8, %v1606_v8  ;;  %v1608_v9 = vpop.permute.xlu1 %1607 }
 0xcf5   :  { %1624 = vst.msk [vmem:[#allocation6 + $0xf] sm:$0x1] %vm1422_vm8, %v1608_v9 }
 0xcf6 LB: > { %v2240_v12 = vpack.c.bf16 %v2857_v46, %v2852_v45  ;;  %v2443_v14 = vmov 0.0|0.0   ;;  %s2444_s17 = smov 96   ;;  %v2243_v2 = vpack.c.bf16 %v2868_v48, %v2862_v47  ;;  %vm2445_vm9 = vmmov 0   ;;  %s2046_s18 = sshll.u32 %s2435_s16, 1  ;;  %s2435_s16 = sphi %s2912_s16, %s1648_s16   ;;  %v2431_v11 = vphi %v2910_v11, %v1836_v11   ;;  %v2427_v10 = vphi %v2908_v10, %v1865_v10  }
 0xcf7   : > { %2239 = vmatprep.subr.bf16.mxu0 %v2443_v14  ;;  %2242 = vmatprep.subr.bf16.mxu1 %v2443_v14  ;;  %v2446_v3 = vmov 0.0   ;;  %s1654_s0 = ssub.s32 7, %s2435_s16  ;;  %s1652_s10 = scalar_lea.vmem [#allocation5], %s2046_s18  ;;  %vm1877_vm10 = vcmask 255104  }
 0xcf8   : > { %1659 = vrot.lane.b32.xlu0 %v2431_v11, %s2444_s17  ;;  %2241 = vmatpush3.bf16.msra.mxu0 %v2240_v12  ;;  %s2939_s4 = sshll.u32 %s1654_s0, 1  ;;  %v1653_v22 = vld [vmem:[%s1652_s10] sm:$0x3]  ;;  %s2447_s30 = smov 32  }
 0xcf9   : > { %2229 = vmatprep.mubr.msk.f32.mxu0 %vm2445_vm9, %v2446_v3  ;;  %2236 = vmatprep.mubr.msk.f32.mxu1 %vm2445_vm9, %v2446_v3  ;;  %s1656_s11 = scalar_lea.vmem [#allocation6], %s2939_s4  ;;  %s2448_s20 = smov 112  }
 0xcfa   : > { %2244 = vmatpush3.bf16.msra.mxu1 %v2243_v2  ;;  %s2449_s8 = smov 16   ;;  %s1870_s9 = scalar_lea.vmem [#allocation7], %s2046_s18 }
 0xcfb   : > { %s1876_s21 = scalar_lea.vmem [#allocation7], %s2939_s4  ;;  %s1648_s16 = sadd.s32 1, %s2435_s16  }
 0xcfc   : > { %1734 = vrot.lane.b32.xlu0 %v2427_v10, %s2444_s17  ;;  %v1657_v24 = vld [vmem:[%s1656_s11] sm:$0x3]  ;;  %p1645_p0 = scmp.ge.s32.totalorder %s1648_s16, 8  }
 0xcfd   :  { %vm1896_vm11 = vcmask (%p1645_p0), 1041409   ;;  %vm1899_vm12 = vcmask (%p1645_p0), 1042434   ;;  %vm1902_vm13 = vcmask (%p1645_p0), 1043459   ;;  %vm1905_vm14 = vcmask (%p1645_p0), 1044484   ;;  %s2450_s12 = smov (%p1645_p0), [#allocation8]  }
 0xcfe   :  { %vm1908_vm15 = vcmask (%p1645_p0), 1045509   ;;  %vm1914_vm1 = vcmask (%p1645_p0), 1047559   ;;  %s1956_s1 = sshll.u32 (%p1645_p0), %s2450_s12, 4  ;;  %s1957_s1 = int_to_ptr.vmem [resolvable:$true] %s1956_s1 }
 0xcff   :  { %s2389_s22 = scalar_lea.vmem (%p1645_p0), %s1957_s1, 256  ;;  %p2394_p2 = scmp.lt.s32.totalorder (%p1645_p0), %s1957_s1, %s1957_s1 }
 0xd00   :  { %p2390_p1 = scmp.ne.s32.totalorder (%p1645_p0), %s1957_s1, %s2389_s22  ;;  %p2395_p3 = scmp.lt.s32.totalorder (%p1645_p0), %s2389_s22, %s2389_s22 }
 0xd02   :  { %p2396_p4 = por (%p1645_p0), %p2395_p3, %p2394_p2 }
 0xd04   :  { %p2397_p5 = pnand (%p1645_p0), %p2396_p4, %p2390_p1 }
 0xd6a   : > { %v1660_v15 = vpop.permute.xlu0 %1659 }
 0xd6b   : > { %2230 = vmatmul.mubr.msk.f32.vlgmr.msra.gmra.mrb[0].mxu0 %vm71_vm2, %v1660_v15 }
 0xd6e   : > { %v1735_v1 = vpop.permute.xlu0 %1734 }
 0xd6f   : > { %2237 = vmatmul.mubr.msk.f32.vlgmr.msra.gmra.mrb[0].mxu1 %vm71_vm2, %v1735_v1 }
 0xe3e   : > { %v1729_v16 = vpop.f32.mrb[0].mxu0 }
 0xe3f   : > { %v1730_v17 = vadd.f32 %v2873_v13, %v1729_v16  ;;  %v2231_v18 = vpop.f32.mrb[1].mxu0 }
 0xe41   : > { %1816 = vrot.lane.b32.xlu1 %v1730_v17, %s2444_s17  ;;  %v1808_v23 = vadd.f32 %v1730_v17, %v1653_v22 }
 0xe42   : > { %v1804_v19 = vpop.f32.mrb[0].mxu1 }
 0xe43   : > { %v1805_v20 = vadd.f32 %v2878_v49, %v1804_v19  ;;  %v2238_v21 = vpop.f32.mrb[1].mxu1  ;;  %v2050_v26 = vmul.f32 -1.442695, %v1808_v23 }
 0xe45   : > { %1845 = vrot.lane.b32.xlu1 %v1805_v20, %s2444_s17  ;;  %v1837_v27 = vadd.f32 %v1805_v20, %v1657_v24  ;;  %2377 = vpow2.f32 %v2050_v26 }
 0xe47   : > { %v2051_v28 = vmul.f32 -1.442695, %v1837_v27 }
 0xe49   : > { %2379 = vpow2.f32 %v2051_v28 }
 0xe4f   : > { %v2378_v29 = vpop.eup %2377 }
 0xe50   : > { %v1812_v30 = vadd.f32 1.0, %v2378_v29 }
 0xe52   : > { %2381 = vrcp.f32 %v1812_v30 }
 0xe53   : > { %v2380_v31 = vpop.eup %2379 }
 0xe54   : > { %v1841_v32 = vadd.f32 1.0, %v2380_v31 }
 0xe56   : > { %2383 = vrcp.f32 %v1841_v32 }
 0xe5c   : > { %v2382_v33 = vpop.eup %2381 }
 0xe60   : > { %v2384_v36 = vpop.eup %2383 }
 0xeb3   : > { %v1817_v34 = vpop.permute.xlu1 %1816 }
 0xeb4   : > { %v1819_v35 = vmul.f32 %v2382_v33, %v1817_v34 }
 0xeb6   : > { %1821 = vrot.lane.b32.xlu0 %v1819_v35, %s2447_s30 }
 0xeb7   : > { %v1846_v37 = vpop.permute.xlu1 %1845 }
 0xeb8   : > { %v1848_v38 = vmul.f32 %v2384_v36, %v1846_v37 }
 0xeba   : > { %1850 = vrot.lane.b32.xlu1 %v1848_v38, %s2447_s30 }
 0xf28   : > { %v1822_v39 = vpop.permute.xlu0 %1821 }
 0xf29   : > { %v1824_v40 = vadd.f32 %v1822_v39, %v1653_v22 }
 0xf2b   : > { %2385 = vtanh.f32 %v1824_v40 }
 0xf2c   : > { %v1851_v41 = vpop.permute.xlu1 %1850 }
 0xf2d   : > { %v1853_v42 = vadd.f32 %v1851_v41, %v1657_v24 }
 0xf2f   : > { %2387 = vtanh.f32 %v1853_v42 }
 0xf35   : > { %v2386_v43 = vpop.eup %2385 }
 0xf36   : > { %v1826_v44 = vsub.f32 %v2431_v11, %v2386_v43 }
 0xf38   : > { %1828 = vrot.lane.b32.xlu0 %v1826_v44, %s2448_s20 }
 0xf39   : > { %v2388_v25 = vpop.eup %2387 }
 0xf3a   : > { %v1855_v50 = vsub.f32 %v2427_v10, %v2388_v25 }
 0xf3c   : > { %1857 = vrot.lane.b32.xlu1 %v1855_v50, %s2448_s20 }
 0xfaa   : > { %v1829_v51 = vpop.permute.xlu0 %1828 }
 0xfab   : > { %v1831_v52 = vmul.f32 %v2382_v33, %v1829_v51 }
 0xfad   : > { %1833 = vrot.lane.b32.xlu0 %v1831_v52, %s2449_s8 }
 0xfae   : > { %v1858_v53 = vpop.permute.xlu1 %1857 }
 0xfaf   : > { %v1860_v54 = vmul.f32 %v2384_v36, %v1858_v53 }
 0xfb1   : > { %1862 = vrot.lane.b32.xlu1 %v1860_v54, %s2449_s8 }
0x101f   : > { %v1834_v55 = vpop.permute.xlu0 %1833 }
0x1020   : > { %v1836_v11 = vadd.f32 %v2386_v43, %v1834_v55  }
0x1022   : > { %1867 = vrot.lane.b32.xlu0 %v1836_v11, %s2444_s17 }
0x1023   : > { %v1863_v56 = vpop.permute.xlu1 %1862 }
0x1024   : > { %v1865_v10 = vadd.f32 %v2388_v25, %v1863_v56  }
0x1026   : > { %1873 = vrot.lane.b32.xlu1 %v1865_v10, %s2448_s20 }
0x1093   :  { %1647 = sbr.rel (!%p1645_p0) target bundleno = 3318 (0xcf6), region = 108 }
0x1094   : > { %v1868_v57 = vpop.permute.xlu0 %1867 }
0x1095   : > { %1871 = vst.msk [vmem:[%s1870_s9] sm:$0x3] %vm66_vm0, %v1868_v57  ;;  %vm1911_vm0 = vcmask (%p1645_p0), 1046534  }
0x1098   : > { %v1874_v58 = vpop.permute.xlu1 %1873 }
0x1099   : > { %1878 = vst.msk [vmem:[%s1876_s21] sm:$0x3] %vm1877_vm10, %v1874_v58 }
0x10a0   :  { %v1879_v59 = vld [vmem:[#allocation7] sm:$0x1]  ;;  %v1880_v60 = vld [vmem:[#allocation7 + $0x2] sm:$0x1]  ;;  %v1881_v61 = vld [vmem:[#allocation7 + $0x4] sm:$0x1] }
0x10a1   :  { %v1882_v62 = vld [vmem:[#allocation7 + $0x6] sm:$0x1]  ;;  %v1883_v63 = vld [vmem:[#allocation7 + $0x8] sm:$0x1]  ;;  %v1884_v0 = vld [vmem:[#allocation7 + $0xa] sm:$0x1] }
0x10a2   :  { %v1885_v4 = vld [vmem:[#allocation7 + $0xc] sm:$0x1]  ;;  %v1895_v5 = vrot.slane %v1880_v60, 7  ;;  %v1886_v6 = vld [vmem:[#allocation7 + $0xe] sm:$0x1]  ;;  %v1898_v7 = vrot.slane %v1881_v61, 6 }
0x10a3   :  { %v1901_v8 = vrot.slane %v1882_v62, 5  ;;  %v1904_v11 = vrot.slane %v1883_v63, 4  ;;  %v1907_v12 = vrot.slane %v1884_v0, 3  ;;  %v1910_v46 = vrot.slane %v1885_v4, 2  ;;  %v1919_v47 = vld [vmem:[#allocation7 + $0x3] sm:$0x1] }
0x10a4   :  { %v1897_v9 = vsel %vm1896_vm11, %v1895_v5, %v1879_v59  ;;  %v1920_v48 = vld [vmem:[#allocation7 + $0x5] sm:$0x1]  ;;  %v1913_v49 = vrot.slane %v1886_v6, 1  ;;  %v1921_v10 = vld [vmem:[#allocation7 + $0x7] sm:$0x1]  ;;  %v1934_v17 = vrot.slane %v1919_v47, 7 }
0x10a5   :  { %v1900_v45 = vsel %vm1899_vm12, %v1898_v7, %v1897_v9  ;;  %v1922_v14 = vld [vmem:[#allocation7 + $0x9] sm:$0x1]  ;;  %v1918_v3 = vld [vmem:[#allocation7 + $0x1] sm:$0x1]  ;;  %v1923_v15 = vld [vmem:[#allocation7 + $0xb] sm:$0x1] }
0x10a6   :  { %v1903_v13 = vsel %vm1902_vm13, %v1901_v8, %v1900_v45  ;;  %v1924_v16 = vld [vmem:[#allocation7 + $0xd] sm:$0x1]  ;;  %v1936_v18 = vrot.slane %v1920_v48, 6  ;;  %v1938_v19 = vrot.slane %v1921_v10, 5  ;;  %v1925_v21 = vld [vmem:[#allocation7 + $0xf] sm:$0x1]  ;;  %v1935_v24 = vsel %vm1896_vm11, %v1934_v17, %v1918_v3 }
0x10a7   :  { %v1906_v2 = vsel %vm1905_vm14, %v1904_v11, %v1903_v13  ;;  %v1940_v22 = vrot.slane %v1922_v14, 4  ;;  %v1942_v26 = vrot.slane %v1923_v15, 3  ;;  %v1944_v28 = vrot.slane %v1924_v16, 2 }
0x10a8   :  { %v1909_v1 = vsel %vm1908_vm15, %v1907_v12, %v1906_v2  ;;  %v1937_v27 = vsel %vm1899_vm12, %v1936_v18, %v1935_v24  ;;  %v1946_v30 = vrot.slane %v1925_v21, 1 }
0x10a9   :  { %v1912_v20 = vsel %vm1911_vm0, %v1910_v46, %v1909_v1  ;;  %v1939_v29 = vsel %vm1902_vm13, %v1938_v19, %v1937_v27 }
0x10aa   :  { %v1915_v23 = vsel %vm1914_vm1, %v1913_v49, %v1912_v20  ;;  %v1941_v31 = vsel %vm1905_vm14, %v1940_v22, %v1939_v29 }
0x10ab   :  { %1917 = vst.msk [vmem:[#allocation8] sm:$0xff] %vm611_vm7, %v1915_v23  ;;  %v1943_v32 = vsel %vm1908_vm15, %v1942_v26, %v1941_v31 }
0x10ac   :  { %v1945_v33 = vsel %vm1911_vm0, %v1944_v28, %v1943_v32 }
0x10ad   :  { %v1947_v34 = vsel %vm1914_vm1, %v1946_v30, %v1945_v33 }
0x10ae   :  { %1950 = vst.msk [vmem:[#allocation8 + $0x8] sm:$0xff] %vm611_vm7, %v1947_v34 }
0x10af   :  { %2400 = shalt.err (!%p2397_p5)
}
0x10b0   :  { %s2401_s14 = scalar_lea.hbm %s3005_s19, 256 }
0x10b1   :  { %p2402_p6 = scmp.ne.s32.totalorder %s3005_s19, %s2401_s14  ;;  %p2405_p7 = scmp.lt.u32.totalorder %s2401_s14, %s3005_s19 }
0x10b3   :  { %p2407_p8 = pnand %p2405_p7, %p2402_p6 }
0x10b5   :  { %2410 = shalt.err (!%p2407_p8)
}
0x10b6   :  { %s2451_s25 = smov 128   ;;  %s2452_s3 = smov 8  }
0x10b7   :  { %1962 = dma.vmem_to_hbm [thread:$0]  %s1957_s1, 256, %s3005_s19, [#allocation9], %s2451_s25, %s2451_s25, %s2452_s3  }
0x10b8   :  { %2423 = dma.done.wait [#allocation9], 256  }
0x10b9   :  { %2424 = vsyncadd [#allocation9], 4294967040 }
0x10ba   :  { %1966 = vsyncpa [#allocation9], 1 }

</bundles_post_ra>
